<compile_context>
chip_gen: v7x
topology: tpu7x:2x2x1
jax: 0.10.0
libtpu: 0.0.40
codegen_flags: <defaults>
</compile_context>

<pallas_src>
import functools

import jax
import jax.numpy as jnp
from jax.experimental import pallas as pl
from jax.experimental.pallas import tpu as pltpu


# ----------------------------------------------------------------------------
# Hardware-aware sizing helpers
# ----------------------------------------------------------------------------
def _vmem_limit_bytes():
    """Per-generation scoped-VMEM limit: ~75% of capacity, capped at 100 MiB.
    v7x (64 MiB)  -> 48 MiB;   v5e/v6e (128 MiB) -> 96 MiB."""
    try:
        cap = int(pltpu.get_tpu_info().vmem_capacity_bytes)
    except Exception:
        cap = 64 * 2 ** 20  # conservative fallback (v7x-sized)
    return min((cap * 3) // 4, 100 * 2 ** 20)


def _pick_time_chunk(T, batch_tile, input_size, hidden_size, output_size,
                     vmem_limit_bytes, max_chunk=512):
    """Largest TT (multiple of 8 dividing T, or T itself) whose per-chunk VMEM
    footprint (double-buffered x/out blocks + gx/h scratch + resident weights)
    fits in roughly half the scoped VMEM limit."""
    H, I, O = hidden_size, input_size, output_size
    weight_bytes = 4 * (I * 4 * H + H * 4 * H + 4 * H + H * O + O)
    budget = max(vmem_limit_bytes // 2 - weight_bytes, 1)
    # per timestep: 2x x-block + 2x out-block (double buffered) + gx scratch + h scratch
    per_step = 4 * batch_tile * (2 * I + 2 * O + 4 * H + H)
    cands = [tt for tt in range(8, min(T, max_chunk) + 1, 8) if T % tt == 0]
    if T <= max_chunk:
        cands.append(T)
    best = None
    for tt in sorted(set(cands)):
        if tt * per_step <= budget:
            best = tt
    if best is None:
        best = cands[0] if cands else T
    return best


# ----------------------------------------------------------------------------
# Fused LSTM + output-Linear kernel.
# Grid: (batch_tiles, time_chunks).  One grid step == one (TB, TT) chunk.
#   x_ref    : (TB, TT, I)   raw inputs for the chunk
#   wih_ref  : (I, 4H)       input->gates weights (transposed, gates [i|f|o|g])
#   whh_ref  : (H, 4H)       hidden->gates weights (transposed, reordered)
#   bias_ref : (1, 4H)       b_ih + b_hh (reordered)
#   wout_ref : (H, O)        output Linear weight (transposed)
#   bout_ref : (1, O)        output Linear bias
#   out_ref  : (TB, TT, O)   final module output for the chunk (only HBM write)
#   gx_scr   : (TB, TT, 4H)  per-chunk x-projection, read back per step
#   hbuf_scr : (TB, TT, H)   per-chunk hidden states staged for the fused Linear
#   h_scr/c_scr : (TB, H)    state carried across time chunks (reset at t==0)
# ----------------------------------------------------------------------------
def _lstm_fused_kernel(x_ref, wih_ref, whh_ref, bias_ref, wout_ref, bout_ref,
                       out_ref, gx_scr, hbuf_scr, h_scr, c_scr, *,
                       hidden_size, time_chunk):
    H = hidden_size
    TT = time_chunk
    TB = x_ref.shape[0]
    t_idx = pl.program_id(1)   # TIME axis (reset must key on time, not batch)

    @pl.when(t_idx == 0)
    def _():
        h_scr[...] = jnp.zeros_like(h_scr)
        c_scr[...] = jnp.zeros_like(c_scr)

    # ---- Fused input projection for this chunk: one MXU matmul into VMEM scratch ----
    x2d = x_ref[...].reshape(TB * TT, x_ref.shape[2])
    gx2d = jnp.dot(x2d, wih_ref[...], preferred_element_type=jnp.float32) + bias_ref[...]
    gx_scr[...] = gx2d.reshape(TB, TT, 4 * H)

    # W_hh is small and grid-invariant: keep it resident (at large H, read it per step instead).
    whh = whh_ref[...]          # (H, 4H)
    h = h_scr[...]              # (TB, H) f32 carry
    c = c_scr[...]              # (TB, H) f32 carry

    # Hoisted lane mask: sigmoid on gate slab [i|f|o] (lanes < 3H), tanh on [g].
    lane = jax.lax.broadcasted_iota(jnp.int32, (TB, 4 * H), 1)
    sig_lane = lane < 3 * H

    # Statically unrolled recurrence: per step only h @ W_hh^T + elementwise.
    # gx is read per step from VMEM scratch (no chunk-wide value kept live in vregs).
    for j in range(TT):
        gates = gx_scr[:, j, :] + jnp.dot(h, whh, preferred_element_type=jnp.float32)
        # Full-width sigmoid + tanh ride the EUP slot; lane-mask blend avoids the
        # sub-vreg slab slice at lane 3H (matters when H % 128 != 0, e.g. H=32).
        act = jnp.where(sig_lane, jax.nn.sigmoid(gates), jnp.tanh(gates))
        i_g = act[:, 0 * H:1 * H]
        f_g = act[:, 1 * H:2 * H]
        o_g = act[:, 2 * H:3 * H]
        g_g = act[:, 3 * H:4 * H]
        c = f_g * c + i_g * g_g
        h = o_g * jnp.tanh(c)
        # Stage h in VMEM scratch (never leaves VMEM) to keep vreg live-ranges bounded.
        hbuf_scr[:, pl.ds(j, 1), :] = h[:, None, :]

    h_scr[...] = h
    c_scr[...] = c

    # ---- Fused output Linear for this chunk: one MXU matmul, one bulk HBM-bound store ----
    h2d = hbuf_scr[...].reshape(TB * TT, H)
    out2d = jnp.dot(h2d, wout_ref[...], preferred_element_type=jnp.float32) + bout_ref[...]
    out_ref[...] = out2d.reshape(TB, TT, out_ref.shape[2]).astype(out_ref.dtype)


# ----------------------------------------------------------------------------
# Full RNNModel forward:  LSTM(batch_first=True) -> Linear, one pallas_call.
# ----------------------------------------------------------------------------
def rnn_model_forward(x, params, time_chunk=None, batch_tile=None):
    """x: (B, T, I) float32.  Returns (B, T, O)."""
    B, T, I = x.shape
    wih_t = params["wih_t"]      # (I, 4H)  gates packed [i|f|o|g]
    whh_t = params["whh_t"]      # (H, 4H)
    bias = params["bias"]        # (1, 4H)  b_ih + b_hh (reordered)
    wout_t = params["wout_t"]    # (H, O)
    bout = params["bout"]        # (1, O)
    H = whh_t.shape[0]
    O = wout_t.shape[1]

    vmem_limit = _vmem_limit_bytes()
    TB = batch_tile if batch_tile is not None else B
    assert B % TB == 0, "batch_tile must divide B"
    TT = time_chunk if time_chunk is not None else _pick_time_chunk(
        T, TB, I, H, O, vmem_limit)
    assert T % TT == 0, "time_chunk must divide T"
    assert TT == T or TT % 8 == 0, "time_chunk must be a multiple of 8 or equal to T"

    kernel = functools.partial(_lstm_fused_kernel, hidden_size=H, time_chunk=TT)

    out = pl.pallas_call(
        kernel,
        out_shape=jax.ShapeDtypeStruct((B, T, O), jnp.float32),
        grid_spec=pltpu.PrefetchScalarGridSpec(
            num_scalar_prefetch=0,
            grid=(B // TB, T // TT),
            in_specs=[
                pl.BlockSpec((TB, TT, I), lambda b, t: (b, t, 0)),    # x chunk
                pl.BlockSpec((I, 4 * H), lambda b, t: (0, 0)),        # W_ih^T (resident)
                pl.BlockSpec((H, 4 * H), lambda b, t: (0, 0)),        # W_hh^T (resident)
                pl.BlockSpec((1, 4 * H), lambda b, t: (0, 0)),        # fused LSTM bias
                pl.BlockSpec((H, O), lambda b, t: (0, 0)),            # W_out^T (resident)
                pl.BlockSpec((1, O), lambda b, t: (0, 0)),            # b_out
            ],
            out_specs=pl.BlockSpec((TB, TT, O), lambda b, t: (b, t, 0)),
            scratch_shapes=[
                pltpu.VMEM((TB, TT, 4 * H), jnp.float32),   # gates_x chunk
                pltpu.VMEM((TB, TT, H), jnp.float32),       # h chunk staging
                pltpu.VMEM((TB, H), jnp.float32),           # h carry
                pltpu.VMEM((TB, H), jnp.float32),           # c carry
            ],
        ),
        compiler_params=pltpu.CompilerParams(
            # batch tiles are independent (shards over v7x's 2 TCs);
            # time is the sequential recurrence.
            dimension_semantics=("parallel", "arbitrary"),
            vmem_limit_bytes=vmem_limit,
        ),
    )(x.astype(jnp.float32), wih_t, whh_t, bias, wout_t, bout)
    return out


# ----------------------------------------------------------------------------
# Parameter handling
# ----------------------------------------------------------------------------
def init_params(key, input_size, hidden_size, output_size):
    """PyTorch-layout params with the default U(-1/sqrt(H), 1/sqrt(H)) init."""
    H, I, O = hidden_size, input_size, output_size
    bound = 1.0 / jnp.sqrt(jnp.float32(H))
    ks = jax.random.split(key, 6)
    u = lambda k, shape: jax.random.uniform(k, shape, jnp.float32, -bound, bound)
    return {
        "w_ih": u(ks[0], (4 * H, I)),    # weight_ih_l0, gate order i,f,g,o
        "w_hh": u(ks[1], (4 * H, H)),    # weight_hh_l0
        "b_ih": u(ks[2], (4 * H,)),
        "b_hh": u(ks[3], (4 * H,)),
        "w_out": u(ks[4], (O, H)),       # nn.Linear weight
        "b_out": u(ks[5], (O,)),
    }


def prepare_params(p, hidden_size):
    """Transpose to matmul layout, fuse biases, and reorder gates i,f,g,o -> i,f,o,g."""
    H = hidden_size

    def reorder(m):  # last-axis columns [i|f|g|o] -> [i|f|o|g]
        return jnp.concatenate(
            [m[..., : 2 * H], m[..., 3 * H:], m[..., 2 * H: 3 * H]], axis=-1)

    return {
        "wih_t": reorder(jnp.transpose(p["w_ih"])),          # (I, 4H)
        "whh_t": reorder(jnp.transpose(p["w_hh"])),          # (H, 4H)
        "bias": reorder((p["b_ih"] + p["b_hh"])[None, :]),   # (1, 4H)
        "wout_t": jnp.transpose(p["w_out"]),                 # (H, O)
        "bout": p["b_out"][None, :],                         # (1, O)
    }


def _lstm_reference(x, p):
    """Pure-JAX reference with PyTorch nn.LSTM semantics (gate order i,f,g,o)."""
    w_ih, w_hh = p["w_ih"], p["w_hh"]
    b = p["b_ih"] + p["b_hh"]
    B, T, I = x.shape
    H = w_hh.shape[1]

    def step(carry, x_t):
        h, c = carry
        gates = x_t @ w_ih.T + h @ w_hh.T + b
        i = jax.nn.sigmoid(gates[:, :H])
        f = jax.nn.sigmoid(gates[:, H:2 * H])
        g = jnp.tanh(gates[:, 2 * H:3 * H])
        o = jax.nn.sigmoid(gates[:, 3 * H:])
        c = f * c + i * g
        h = o * jnp.tanh(c)
        return (h, c), h

    init = (jnp.zeros((B, H), jnp.float32), jnp.zeros((B, H), jnp.float32))
    _, hs = jax.lax.scan(step, init, jnp.transpose(x, (1, 0, 2)))
    hs = jnp.transpose(hs, (1, 0, 2))                        # (B, T, H)
    return hs @ p["w_out"].T + p["b_out"]


if __name__ == "__main__":
    key = jax.random.PRNGKey(0)
    # batch, seq, input_size, hidden_size, output_size
    B, T, I, H, O = 2, 16, 4, 32, 3

    k_x, k_p = jax.random.split(key)
    x = jax.random.normal(k_x, (B, T, I), dtype=jnp.float32)
    torch_params = init_params(k_p, I, H, O)
    params = prepare_params(torch_params, H)

    # time_chunk=8 -> grid (1, 2): exercises the cross-chunk (h, c) carry.
    out = rnn_model_forward(x, params, time_chunk=8)
    jax.block_until_ready(out)
    assert out.shape == (B, T, O)

    # Tolerance accounts for default TPU f32 matmul precision (reduced-precision passes);
    # set precision=jax.lax.Precision.HIGHEST on the dots if bitwise parity is required.
    ref = _lstm_reference(x, torch_params)
    err = float(jnp.max(jnp.abs(out - ref)))
    assert err < 3e-2, f"mismatch vs reference LSTM: max abs err = {err}"

    print("KERNEL_OK")
</pallas_src>

<mosaic_0001>
module attributes {stable_mosaic.version = 11 : i64} {
  func.func @_lstm_fused_kernel(%arg0: i32, %arg1: i32, %arg2: memref<2x8x4xf32, #tpu.memory_space<vmem>>, %arg3: memref<4x128xf32, #tpu.memory_space<vmem>>, %arg4: memref<32x128xf32, #tpu.memory_space<vmem>>, %arg5: memref<1x128xf32, #tpu.memory_space<vmem>>, %arg6: memref<32x3xf32, #tpu.memory_space<vmem>>, %arg7: memref<1x3xf32, #tpu.memory_space<vmem>>, %arg8: memref<2x8x3xf32, #tpu.memory_space<vmem>>, %arg9: memref<2x8x128xf32, #tpu.memory_space<vmem>>, %arg10: memref<2x8x32xf32, #tpu.memory_space<vmem>>, %arg11: memref<2x32xf32, #tpu.memory_space<vmem>>, %arg12: memref<2x32xf32, #tpu.memory_space<vmem>>) attributes {dimension_semantics = [#tpu.dimension_semantics<parallel>, #tpu.dimension_semantics<arbitrary>], iteration_bounds = array<i64: 1, 2>, scalar_prefetch = 0 : i64, scratch_operands = 4 : i64, tpu.core_type = #tpu.core_type<tc>, window_params = [{transform_indices = @transform_0, window_bounds = array<i64: 2, 8, 4>}, {pipeline_mode = #tpu.pipeline_mode<synchronous>, transform_indices = @transform_1, window_bounds = array<i64: 4, 128>}, {pipeline_mode = #tpu.pipeline_mode<synchronous>, transform_indices = @transform_2, window_bounds = array<i64: 32, 128>}, {pipeline_mode = #tpu.pipeline_mode<synchronous>, transform_indices = @transform_3, window_bounds = array<i64: 1, 128>}, {pipeline_mode = #tpu.pipeline_mode<synchronous>, transform_indices = @transform_4, window_bounds = array<i64: 32, 3>}, {pipeline_mode = #tpu.pipeline_mode<synchronous>, transform_indices = @transform_5, window_bounds = array<i64: 1, 3>}, {transform_indices = @transform_6, window_bounds = array<i64: 2, 8, 3>}]} {
    %c0_i32 = arith.constant 0 : i32
    %0 = arith.cmpi eq, %arg1, %c0_i32 : i32
    %1 = arith.extui %0 : i1 to i32
    %c0_i32_0 = arith.constant 0 : i32
    %2 = arith.cmpi ne, %1, %c0_i32_0 : i32
    scf.if %2 {
      %cst_88 = arith.constant 0.000000e+00 : f32
      %205 = vector.broadcast %cst_88 : f32 to vector<2x32xf32>
      %c0_89 = arith.constant 0 : index
      %c0_90 = arith.constant 0 : index
      %206 = vector.load %arg11[%c0_89, %c0_90] : memref<2x32xf32, #tpu.memory_space<vmem>>, vector<2x32xf32>
      tpu.vector_store %arg11[%c0_89, %c0_90], %205 {strides = array<i32>} : memref<2x32xf32, #tpu.memory_space<vmem>>, vector<2x32xf32>,
      %cst_91 = arith.constant 0.000000e+00 : f32
      %207 = vector.broadcast %cst_91 : f32 to vector<2x32xf32>
      %c0_92 = arith.constant 0 : index
      %c0_93 = arith.constant 0 : index
      %208 = vector.load %arg12[%c0_92, %c0_93] : memref<2x32xf32, #tpu.memory_space<vmem>>, vector<2x32xf32>
      tpu.vector_store %arg12[%c0_92, %c0_93], %207 {strides = array<i32>} : memref<2x32xf32, #tpu.memory_space<vmem>>, vector<2x32xf32>,
    } else {
    }
    %c0 = arith.constant 0 : index
    %c0_1 = arith.constant 0 : index
    %c0_2 = arith.constant 0 : index
    %3 = vector.load %arg2[%c0, %c0_1, %c0_2] : memref<2x8x4xf32, #tpu.memory_space<vmem>>, vector<2x8x4xf32>
    %4 = vector.shape_cast %3 : vector<2x8x4xf32> to vector<16x4xf32>
    %c0_3 = arith.constant 0 : index
    %c0_4 = arith.constant 0 : index
    %5 = vector.load %arg3[%c0_3, %c0_4] : memref<4x128xf32, #tpu.memory_space<vmem>>, vector<4x128xf32>
    %cst = arith.constant dense<0.000000e+00> : vector<16x128xf32>
    %6 = tpu.matmul %4, %5, %cst {dimension_numbers = #tpu.dot_dimension_numbers<[1], [0], [0], [1], [0, 0, 1, 1], [], []>} : vector<16x4xf32>, vector<4x128xf32>, vector<16x128xf32> -> vector<16x128xf32>
    %c0_5 = arith.constant 0 : index
    %c0_6 = arith.constant 0 : index
    %7 = vector.load %arg5[%c0_5, %c0_6] : memref<1x128xf32, #tpu.memory_space<vmem>>, vector<1x128xf32>
    %8 = vector.broadcast %7 : vector<1x128xf32> to vector<16x128xf32>
    %9 = arith.addf %6, %8 : vector<16x128xf32>
    %10 = vector.shape_cast %9 : vector<16x128xf32> to vector<2x8x128xf32>
    %c0_7 = arith.constant 0 : index
    %c0_8 = arith.constant 0 : index
    %c0_9 = arith.constant 0 : index
    %11 = vector.load %arg9[%c0_7, %c0_8, %c0_9] : memref<2x8x128xf32, #tpu.memory_space<vmem>>, vector<2x8x128xf32>
    tpu.vector_store %arg9[%c0_7, %c0_8, %c0_9], %10 {strides = array<i32>} : memref<2x8x128xf32, #tpu.memory_space<vmem>>, vector<2x8x128xf32>,
    %c0_10 = arith.constant 0 : index
    %c0_11 = arith.constant 0 : index
    %12 = vector.load %arg4[%c0_10, %c0_11] : memref<32x128xf32, #tpu.memory_space<vmem>>, vector<32x128xf32>
    %c0_12 = arith.constant 0 : index
    %c0_13 = arith.constant 0 : index
    %13 = vector.load %arg11[%c0_12, %c0_13] : memref<2x32xf32, #tpu.memory_space<vmem>>, vector<2x32xf32>
    %c0_14 = arith.constant 0 : index
    %c0_15 = arith.constant 0 : index
    %14 = vector.load %arg12[%c0_14, %c0_15] : memref<2x32xf32, #tpu.memory_space<vmem>>, vector<2x32xf32>
    %15 = tpu.iota {dimensions = array<i32: 1>} : vector<2x128xi32>
    %c96_i32 = arith.constant 96 : i32
    %16 = vector.broadcast %c96_i32 : i32 to vector<2x128xi32>
    %17 = arith.cmpi slt, %15, %16 : vector<2x128xi32>
    %c0_16 = arith.constant 0 : index
    %c0_17 = arith.constant 0 : index
    %c0_18 = arith.constant 0 : index
    %18 = vector.load %arg9[%c0_16, %c0_17, %c0_18] : memref<2x8x128xf32, #tpu.memory_space<vmem>>, vector<2x1x128xf32>
    %19 = vector.shape_cast %18 : vector<2x1x128xf32> to vector<2x128xf32>
    %cst_19 = arith.constant dense<0.000000e+00> : vector<2x128xf32>
    %20 = tpu.matmul %13, %12, %cst_19 {dimension_numbers = #tpu.dot_dimension_numbers<[1], [0], [0], [1], [0, 0, 1, 1], [], []>} : vector<2x32xf32>, vector<32x128xf32>, vector<2x128xf32> -> vector<2x128xf32>
    %21 = arith.addf %19, %20 : vector<2x128xf32>
    %22 = arith.negf %21 : vector<2x128xf32>
    %23 = math.exp %22 : vector<2x128xf32>
    %cst_20 = arith.constant 1.000000e+00 : f32
    %24 = vector.broadcast %cst_20 : f32 to vector<2x128xf32>
    %25 = arith.addf %24, %23 : vector<2x128xf32>
    %26 = arith.divf %24, %25 : vector<2x128xf32>
    %27 = math.tanh %21 : vector<2x128xf32>
    %28 = arith.select %17, %26, %27 : vector<2x128xi1>, vector<2x128xf32>
    %29 = vector.extract_strided_slice %28 {offsets = [0, 0], sizes = [2, 32], strides = [1, 1]} : vector<2x128xf32> to vector<2x32xf32>
    %30 = vector.extract_strided_slice %28 {offsets = [0, 32], sizes = [2, 32], strides = [1, 1]} : vector<2x128xf32> to vector<2x32xf32>
    %31 = vector.extract_strided_slice %28 {offsets = [0, 64], sizes = [2, 32], strides = [1, 1]} : vector<2x128xf32> to vector<2x32xf32>
    %32 = vector.extract_strided_slice %28 {offsets = [0, 96], sizes = [2, 32], strides = [1, 1]} : vector<2x128xf32> to vector<2x32xf32>
    %33 = arith.mulf %30, %14 : vector<2x32xf32>
    %34 = arith.mulf %29, %32 : vector<2x32xf32>
    %35 = arith.addf %33, %34 : vector<2x32xf32>
    %36 = math.tanh %35 : vector<2x32xf32>
    %37 = arith.mulf %31, %36 : vector<2x32xf32>
    %38 = vector.shape_cast %37 : vector<2x32xf32> to vector<2x1x32xf32>
    %c0_21 = arith.constant 0 : index
    %c0_22 = arith.constant 0 : index
    %c0_23 = arith.constant 0 : index
    %39 = vector.load %arg10[%c0_21, %c0_22, %c0_23] : memref<2x8x32xf32, #tpu.memory_space<vmem>>, vector<2x1x32xf32>
    tpu.vector_store %arg10[%c0_21, %c0_22, %c0_23], %38 {strides = array<i32>} : memref<2x8x32xf32, #tpu.memory_space<vmem>>, vector<2x1x32xf32>,
    %c0_24 = arith.constant 0 : index
    %c1 = arith.constant 1 : index
    %c0_25 = arith.constant 0 : index
    %40 = vector.load %arg9[%c0_24, %c1, %c0_25] : memref<2x8x128xf32, #tpu.memory_space<vmem>>, vector<2x1x128xf32>
    %41 = vector.shape_cast %40 : vector<2x1x128xf32> to vector<2x128xf32>
    %cst_26 = arith.constant dense<0.000000e+00> : vector<2x128xf32>
    %42 = tpu.matmul %37, %12, %cst_26 {dimension_numbers = #tpu.dot_dimension_numbers<[1], [0], [0], [1], [0, 0, 1, 1], [], []>} : vector<2x32xf32>, vector<32x128xf32>, vector<2x128xf32> -> vector<2x128xf32>
    %43 = arith.addf %41, %42 : vector<2x128xf32>
    %44 = arith.negf %43 : vector<2x128xf32>
    %45 = math.exp %44 : vector<2x128xf32>
    %cst_27 = arith.constant 1.000000e+00 : f32
    %46 = vector.broadcast %cst_27 : f32 to vector<2x128xf32>
    %47 = arith.addf %46, %45 : vector<2x128xf32>
    %48 = arith.divf %46, %47 : vector<2x128xf32>
    %49 = math.tanh %43 : vector<2x128xf32>
    %50 = arith.select %17, %48, %49 : vector<2x128xi1>, vector<2x128xf32>
    %51 = vector.extract_strided_slice %50 {offsets = [0, 0], sizes = [2, 32], strides = [1, 1]} : vector<2x128xf32> to vector<2x32xf32>
    %52 = vector.extract_strided_slice %50 {offsets = [0, 32], sizes = [2, 32], strides = [1, 1]} : vector<2x128xf32> to vector<2x32xf32>
    %53 = vector.extract_strided_slice %50 {offsets = [0, 64], sizes = [2, 32], strides = [1, 1]} : vector<2x128xf32> to vector<2x32xf32>
    %54 = vector.extract_strided_slice %50 {offsets = [0, 96], sizes = [2, 32], strides = [1, 1]} : vector<2x128xf32> to vector<2x32xf32>
    %55 = arith.mulf %52, %35 : vector<2x32xf32>
    %56 = arith.mulf %51, %54 : vector<2x32xf32>
    %57 = arith.addf %55, %56 : vector<2x32xf32>
    %58 = math.tanh %57 : vector<2x32xf32>
    %59 = arith.mulf %53, %58 : vector<2x32xf32>
    %60 = vector.shape_cast %59 : vector<2x32xf32> to vector<2x1x32xf32>
    %c0_28 = arith.constant 0 : index
    %c1_29 = arith.constant 1 : index
    %c0_30 = arith.constant 0 : index
    %61 = vector.load %arg10[%c0_28, %c1_29, %c0_30] : memref<2x8x32xf32, #tpu.memory_space<vmem>>, vector<2x1x32xf32>
    tpu.vector_store %arg10[%c0_28, %c1_29, %c0_30], %60 {strides = array<i32>} : memref<2x8x32xf32, #tpu.memory_space<vmem>>, vector<2x1x32xf32>,
    %c0_31 = arith.constant 0 : index
    %c2 = arith.constant 2 : index
    %c0_32 = arith.constant 0 : index
    %62 = vector.load %arg9[%c0_31, %c2, %c0_32] : memref<2x8x128xf32, #tpu.memory_space<vmem>>, vector<2x1x128xf32>
    %63 = vector.shape_cast %62 : vector<2x1x128xf32> to vector<2x128xf32>
    %cst_33 = arith.constant dense<0.000000e+00> : vector<2x128xf32>
    %64 = tpu.matmul %59, %12, %cst_33 {dimension_numbers = #tpu.dot_dimension_numbers<[1], [0], [0], [1], [0, 0, 1, 1], [], []>} : vector<2x32xf32>, vector<32x128xf32>, vector<2x128xf32> -> vector<2x128xf32>
    %65 = arith.addf %63, %64 : vector<2x128xf32>
    %66 = arith.negf %65 : vector<2x128xf32>
    %67 = math.exp %66 : vector<2x128xf32>
    %cst_34 = arith.constant 1.000000e+00 : f32
    %68 = vector.broadcast %cst_34 : f32 to vector<2x128xf32>
    %69 = arith.addf %68, %67 : vector<2x128xf32>
    %70 = arith.divf %68, %69 : vector<2x128xf32>
    %71 = math.tanh %65 : vector<2x128xf32>
    %72 = arith.select %17, %70, %71 : vector<2x128xi1>, vector<2x128xf32>
    %73 = vector.extract_strided_slice %72 {offsets = [0, 0], sizes = [2, 32], strides = [1, 1]} : vector<2x128xf32> to vector<2x32xf32>
    %74 = vector.extract_strided_slice %72 {offsets = [0, 32], sizes = [2, 32], strides = [1, 1]} : vector<2x128xf32> to vector<2x32xf32>
    %75 = vector.extract_strided_slice %72 {offsets = [0, 64], sizes = [2, 32], strides = [1, 1]} : vector<2x128xf32> to vector<2x32xf32>
    %76 = vector.extract_strided_slice %72 {offsets = [0, 96], sizes = [2, 32], strides = [1, 1]} : vector<2x128xf32> to vector<2x32xf32>
    %77 = arith.mulf %74, %57 : vector<2x32xf32>
    %78 = arith.mulf %73, %76 : vector<2x32xf32>
    %79 = arith.addf %77, %78 : vector<2x32xf32>
    %80 = math.tanh %79 : vector<2x32xf32>
    %81 = arith.mulf %75, %80 : vector<2x32xf32>
    %82 = vector.shape_cast %81 : vector<2x32xf32> to vector<2x1x32xf32>
    %c0_35 = arith.constant 0 : index
    %c2_36 = arith.constant 2 : index
    %c0_37 = arith.constant 0 : index
    %83 = vector.load %arg10[%c0_35, %c2_36, %c0_37] : memref<2x8x32xf32, #tpu.memory_space<vmem>>, vector<2x1x32xf32>
    tpu.vector_store %arg10[%c0_35, %c2_36, %c0_37], %82 {strides = array<i32>} : memref<2x8x32xf32, #tpu.memory_space<vmem>>, vector<2x1x32xf32>,
    %c0_38 = arith.constant 0 : index
    %c3 = arith.constant 3 : index
    %c0_39 = arith.constant 0 : index
    %84 = vector.load %arg9[%c0_38, %c3, %c0_39] : memref<2x8x128xf32, #tpu.memory_space<vmem>>, vector<2x1x128xf32>
    %85 = vector.shape_cast %84 : vector<2x1x128xf32> to vector<2x128xf32>
    %cst_40 = arith.constant dense<0.000000e+00> : vector<2x128xf32>
    %86 = tpu.matmul %81, %12, %cst_40 {dimension_numbers = #tpu.dot_dimension_numbers<[1], [0], [0], [1], [0, 0, 1, 1], [], []>} : vector<2x32xf32>, vector<32x128xf32>, vector<2x128xf32> -> vector<2x128xf32>
    %87 = arith.addf %85, %86 : vector<2x128xf32>
    %88 = arith.negf %87 : vector<2x128xf32>
    %89 = math.exp %88 : vector<2x128xf32>
    %cst_41 = arith.constant 1.000000e+00 : f32
    %90 = vector.broadcast %cst_41 : f32 to vector<2x128xf32>
    %91 = arith.addf %90, %89 : vector<2x128xf32>
    %92 = arith.divf %90, %91 : vector<2x128xf32>
    %93 = math.tanh %87 : vector<2x128xf32>
    %94 = arith.select %17, %92, %93 : vector<2x128xi1>, vector<2x128xf32>
    %95 = vector.extract_strided_slice %94 {offsets = [0, 0], sizes = [2, 32], strides = [1, 1]} : vector<2x128xf32> to vector<2x32xf32>
    %96 = vector.extract_strided_slice %94 {offsets = [0, 32], sizes = [2, 32], strides = [1, 1]} : vector<2x128xf32> to vector<2x32xf32>
    %97 = vector.extract_strided_slice %94 {offsets = [0, 64], sizes = [2, 32], strides = [1, 1]} : vector<2x128xf32> to vector<2x32xf32>
    %98 = vector.extract_strided_slice %94 {offsets = [0, 96], sizes = [2, 32], strides = [1, 1]} : vector<2x128xf32> to vector<2x32xf32>
    %99 = arith.mulf %96, %79 : vector<2x32xf32>
    %100 = arith.mulf %95, %98 : vector<2x32xf32>
    %101 = arith.addf %99, %100 : vector<2x32xf32>
    %102 = math.tanh %101 : vector<2x32xf32>
    %103 = arith.mulf %97, %102 : vector<2x32xf32>
    %104 = vector.shape_cast %103 : vector<2x32xf32> to vector<2x1x32xf32>
    %c0_42 = arith.constant 0 : index
    %c3_43 = arith.constant 3 : index
    %c0_44 = arith.constant 0 : index
    %105 = vector.load %arg10[%c0_42, %c3_43, %c0_44] : memref<2x8x32xf32, #tpu.memory_space<vmem>>, vector<2x1x32xf32>
    tpu.vector_store %arg10[%c0_42, %c3_43, %c0_44], %104 {strides = array<i32>} : memref<2x8x32xf32, #tpu.memory_space<vmem>>, vector<2x1x32xf32>,
    %c0_45 = arith.constant 0 : index
    %c4 = arith.constant 4 : index
    %c0_46 = arith.constant 0 : index
    %106 = vector.load %arg9[%c0_45, %c4, %c0_46] : memref<2x8x128xf32, #tpu.memory_space<vmem>>, vector<2x1x128xf32>
    %107 = vector.shape_cast %106 : vector<2x1x128xf32> to vector<2x128xf32>
    %cst_47 = arith.constant dense<0.000000e+00> : vector<2x128xf32>
    %108 = tpu.matmul %103, %12, %cst_47 {dimension_numbers = #tpu.dot_dimension_numbers<[1], [0], [0], [1], [0, 0, 1, 1], [], []>} : vector<2x32xf32>, vector<32x128xf32>, vector<2x128xf32> -> vector<2x128xf32>
    %109 = arith.addf %107, %108 : vector<2x128xf32>
    %110 = arith.negf %109 : vector<2x128xf32>
    %111 = math.exp %110 : vector<2x128xf32>
    %cst_48 = arith.constant 1.000000e+00 : f32
    %112 = vector.broadcast %cst_48 : f32 to vector<2x128xf32>
    %113 = arith.addf %112, %111 : vector<2x128xf32>
    %114 = arith.divf %112, %113 : vector<2x128xf32>
    %115 = math.tanh %109 : vector<2x128xf32>
    %116 = arith.select %17, %114, %115 : vector<2x128xi1>, vector<2x128xf32>
    %117 = vector.extract_strided_slice %116 {offsets = [0, 0], sizes = [2, 32], strides = [1, 1]} : vector<2x128xf32> to vector<2x32xf32>
    %118 = vector.extract_strided_slice %116 {offsets = [0, 32], sizes = [2, 32], strides = [1, 1]} : vector<2x128xf32> to vector<2x32xf32>
    %119 = vector.extract_strided_slice %116 {offsets = [0, 64], sizes = [2, 32], strides = [1, 1]} : vector<2x128xf32> to vector<2x32xf32>
    %120 = vector.extract_strided_slice %116 {offsets = [0, 96], sizes = [2, 32], strides = [1, 1]} : vector<2x128xf32> to vector<2x32xf32>
    %121 = arith.mulf %118, %101 : vector<2x32xf32>
    %122 = arith.mulf %117, %120 : vector<2x32xf32>
    %123 = arith.addf %121, %122 : vector<2x32xf32>
    %124 = math.tanh %123 : vector<2x32xf32>
    %125 = arith.mulf %119, %124 : vector<2x32xf32>
    %126 = vector.shape_cast %125 : vector<2x32xf32> to vector<2x1x32xf32>
    %c0_49 = arith.constant 0 : index
    %c4_50 = arith.constant 4 : index
    %c0_51 = arith.constant 0 : index
    %127 = vector.load %arg10[%c0_49, %c4_50, %c0_51] : memref<2x8x32xf32, #tpu.memory_space<vmem>>, vector<2x1x32xf32>
    tpu.vector_store %arg10[%c0_49, %c4_50, %c0_51], %126 {strides = array<i32>} : memref<2x8x32xf32, #tpu.memory_space<vmem>>, vector<2x1x32xf32>,
    %c0_52 = arith.constant 0 : index
    %c5 = arith.constant 5 : index
    %c0_53 = arith.constant 0 : index
    %128 = vector.load %arg9[%c0_52, %c5, %c0_53] : memref<2x8x128xf32, #tpu.memory_space<vmem>>, vector<2x1x128xf32>
    %129 = vector.shape_cast %128 : vector<2x1x128xf32> to vector<2x128xf32>
    %cst_54 = arith.constant dense<0.000000e+00> : vector<2x128xf32>
    %130 = tpu.matmul %125, %12, %cst_54 {dimension_numbers = #tpu.dot_dimension_numbers<[1], [0], [0], [1], [0, 0, 1, 1], [], []>} : vector<2x32xf32>, vector<32x128xf32>, vector<2x128xf32> -> vector<2x128xf32>
    %131 = arith.addf %129, %130 : vector<2x128xf32>
    %132 = arith.negf %131 : vector<2x128xf32>
    %133 = math.exp %132 : vector<2x128xf32>
    %cst_55 = arith.constant 1.000000e+00 : f32
    %134 = vector.broadcast %cst_55 : f32 to vector<2x128xf32>
    %135 = arith.addf %134, %133 : vector<2x128xf32>
    %136 = arith.divf %134, %135 : vector<2x128xf32>
    %137 = math.tanh %131 : vector<2x128xf32>
    %138 = arith.select %17, %136, %137 : vector<2x128xi1>, vector<2x128xf32>
    %139 = vector.extract_strided_slice %138 {offsets = [0, 0], sizes = [2, 32], strides = [1, 1]} : vector<2x128xf32> to vector<2x32xf32>
    %140 = vector.extract_strided_slice %138 {offsets = [0, 32], sizes = [2, 32], strides = [1, 1]} : vector<2x128xf32> to vector<2x32xf32>
    %141 = vector.extract_strided_slice %138 {offsets = [0, 64], sizes = [2, 32], strides = [1, 1]} : vector<2x128xf32> to vector<2x32xf32>
    %142 = vector.extract_strided_slice %138 {offsets = [0, 96], sizes = [2, 32], strides = [1, 1]} : vector<2x128xf32> to vector<2x32xf32>
    %143 = arith.mulf %140, %123 : vector<2x32xf32>
    %144 = arith.mulf %139, %142 : vector<2x32xf32>
    %145 = arith.addf %143, %144 : vector<2x32xf32>
    %146 = math.tanh %145 : vector<2x32xf32>
    %147 = arith.mulf %141, %146 : vector<2x32xf32>
    %148 = vector.shape_cast %147 : vector<2x32xf32> to vector<2x1x32xf32>
    %c0_56 = arith.constant 0 : index
    %c5_57 = arith.constant 5 : index
    %c0_58 = arith.constant 0 : index
    %149 = vector.load %arg10[%c0_56, %c5_57, %c0_58] : memref<2x8x32xf32, #tpu.memory_space<vmem>>, vector<2x1x32xf32>
    tpu.vector_store %arg10[%c0_56, %c5_57, %c0_58], %148 {strides = array<i32>} : memref<2x8x32xf32, #tpu.memory_space<vmem>>, vector<2x1x32xf32>,
    %c0_59 = arith.constant 0 : index
    %c6 = arith.constant 6 : index
    %c0_60 = arith.constant 0 : index
    %150 = vector.load %arg9[%c0_59, %c6, %c0_60] : memref<2x8x128xf32, #tpu.memory_space<vmem>>, vector<2x1x128xf32>
    %151 = vector.shape_cast %150 : vector<2x1x128xf32> to vector<2x128xf32>
    %cst_61 = arith.constant dense<0.000000e+00> : vector<2x128xf32>
    %152 = tpu.matmul %147, %12, %cst_61 {dimension_numbers = #tpu.dot_dimension_numbers<[1], [0], [0], [1], [0, 0, 1, 1], [], []>} : vector<2x32xf32>, vector<32x128xf32>, vector<2x128xf32> -> vector<2x128xf32>
    %153 = arith.addf %151, %152 : vector<2x128xf32>
    %154 = arith.negf %153 : vector<2x128xf32>
    %155 = math.exp %154 : vector<2x128xf32>
    %cst_62 = arith.constant 1.000000e+00 : f32
    %156 = vector.broadcast %cst_62 : f32 to vector<2x128xf32>
    %157 = arith.addf %156, %155 : vector<2x128xf32>
    %158 = arith.divf %156, %157 : vector<2x128xf32>
    %159 = math.tanh %153 : vector<2x128xf32>
    %160 = arith.select %17, %158, %159 : vector<2x128xi1>, vector<2x128xf32>
    %161 = vector.extract_strided_slice %160 {offsets = [0, 0], sizes = [2, 32], strides = [1, 1]} : vector<2x128xf32> to vector<2x32xf32>
    %162 = vector.extract_strided_slice %160 {offsets = [0, 32], sizes = [2, 32], strides = [1, 1]} : vector<2x128xf32> to vector<2x32xf32>
    %163 = vector.extract_strided_slice %160 {offsets = [0, 64], sizes = [2, 32], strides = [1, 1]} : vector<2x128xf32> to vector<2x32xf32>
    %164 = vector.extract_strided_slice %160 {offsets = [0, 96], sizes = [2, 32], strides = [1, 1]} : vector<2x128xf32> to vector<2x32xf32>
    %165 = arith.mulf %162, %145 : vector<2x32xf32>
    %166 = arith.mulf %161, %164 : vector<2x32xf32>
    %167 = arith.addf %165, %166 : vector<2x32xf32>
    %168 = math.tanh %167 : vector<2x32xf32>
    %169 = arith.mulf %163, %168 : vector<2x32xf32>
    %170 = vector.shape_cast %169 : vector<2x32xf32> to vector<2x1x32xf32>
    %c0_63 = arith.constant 0 : index
    %c6_64 = arith.constant 6 : index
    %c0_65 = arith.constant 0 : index
    %171 = vector.load %arg10[%c0_63, %c6_64, %c0_65] : memref<2x8x32xf32, #tpu.memory_space<vmem>>, vector<2x1x32xf32>
    tpu.vector_store %arg10[%c0_63, %c6_64, %c0_65], %170 {strides = array<i32>} : memref<2x8x32xf32, #tpu.memory_space<vmem>>, vector<2x1x32xf32>,
    %c0_66 = arith.constant 0 : index
    %c7 = arith.constant 7 : index
    %c0_67 = arith.constant 0 : index
    %172 = vector.load %arg9[%c0_66, %c7, %c0_67] : memref<2x8x128xf32, #tpu.memory_space<vmem>>, vector<2x1x128xf32>
    %173 = vector.shape_cast %172 : vector<2x1x128xf32> to vector<2x128xf32>
    %cst_68 = arith.constant dense<0.000000e+00> : vector<2x128xf32>
    %174 = tpu.matmul %169, %12, %cst_68 {dimension_numbers = #tpu.dot_dimension_numbers<[1], [0], [0], [1], [0, 0, 1, 1], [], []>} : vector<2x32xf32>, vector<32x128xf32>, vector<2x128xf32> -> vector<2x128xf32>
    %175 = arith.addf %173, %174 : vector<2x128xf32>
    %176 = arith.negf %175 : vector<2x128xf32>
    %177 = math.exp %176 : vector<2x128xf32>
    %cst_69 = arith.constant 1.000000e+00 : f32
    %178 = vector.broadcast %cst_69 : f32 to vector<2x128xf32>
    %179 = arith.addf %178, %177 : vector<2x128xf32>
    %180 = arith.divf %178, %179 : vector<2x128xf32>
    %181 = math.tanh %175 : vector<2x128xf32>
    %182 = arith.select %17, %180, %181 : vector<2x128xi1>, vector<2x128xf32>
    %183 = vector.extract_strided_slice %182 {offsets = [0, 0], sizes = [2, 32], strides = [1, 1]} : vector<2x128xf32> to vector<2x32xf32>
    %184 = vector.extract_strided_slice %182 {offsets = [0, 32], sizes = [2, 32], strides = [1, 1]} : vector<2x128xf32> to vector<2x32xf32>
    %185 = vector.extract_strided_slice %182 {offsets = [0, 64], sizes = [2, 32], strides = [1, 1]} : vector<2x128xf32> to vector<2x32xf32>
    %186 = vector.extract_strided_slice %182 {offsets = [0, 96], sizes = [2, 32], strides = [1, 1]} : vector<2x128xf32> to vector<2x32xf32>
    %187 = arith.mulf %184, %167 : vector<2x32xf32>
    %188 = arith.mulf %183, %186 : vector<2x32xf32>
    %189 = arith.addf %187, %188 : vector<2x32xf32>
    %190 = math.tanh %189 : vector<2x32xf32>
    %191 = arith.mulf %185, %190 : vector<2x32xf32>
    %192 = vector.shape_cast %191 : vector<2x32xf32> to vector<2x1x32xf32>
    %c0_70 = arith.constant 0 : index
    %c7_71 = arith.constant 7 : index
    %c0_72 = arith.constant 0 : index
    %193 = vector.load %arg10[%c0_70, %c7_71, %c0_72] : memref<2x8x32xf32, #tpu.memory_space<vmem>>, vector<2x1x32xf32>
    tpu.vector_store %arg10[%c0_70, %c7_71, %c0_72], %192 {strides = array<i32>} : memref<2x8x32xf32, #tpu.memory_space<vmem>>, vector<2x1x32xf32>,
    %c0_73 = arith.constant 0 : index
    %c0_74 = arith.constant 0 : index
    %194 = vector.load %arg11[%c0_73, %c0_74] : memref<2x32xf32, #tpu.memory_space<vmem>>, vector<2x32xf32>
    tpu.vector_store %arg11[%c0_73, %c0_74], %191 {strides = array<i32>} : memref<2x32xf32, #tpu.memory_space<vmem>>, vector<2x32xf32>,
    %c0_75 = arith.constant 0 : index
    %c0_76 = arith.constant 0 : index
    %195 = vector.load %arg12[%c0_75, %c0_76] : memref<2x32xf32, #tpu.memory_space<vmem>>, vector<2x32xf32>
    tpu.vector_store %arg12[%c0_75, %c0_76], %189 {strides = array<i32>} : memref<2x32xf32, #tpu.memory_space<vmem>>, vector<2x32xf32>,
    %c0_77 = arith.constant 0 : index
    %c0_78 = arith.constant 0 : index
    %c0_79 = arith.constant 0 : index
    %196 = vector.load %arg10[%c0_77, %c0_78, %c0_79] : memref<2x8x32xf32, #tpu.memory_space<vmem>>, vector<2x8x32xf32>
    %197 = vector.shape_cast %196 : vector<2x8x32xf32> to vector<16x32xf32>
    %c0_80 = arith.constant 0 : index
    %c0_81 = arith.constant 0 : index
    %198 = vector.load %arg6[%c0_80, %c0_81] : memref<32x3xf32, #tpu.memory_space<vmem>>, vector<32x3xf32>
    %cst_82 = arith.constant dense<0.000000e+00> : vector<16x3xf32>
    %199 = tpu.matmul %197, %198, %cst_82 {dimension_numbers = #tpu.dot_dimension_numbers<[1], [0], [0], [1], [0, 0, 1, 1], [], []>} : vector<16x32xf32>, vector<32x3xf32>, vector<16x3xf32> -> vector<16x3xf32>
    %c0_83 = arith.constant 0 : index
    %c0_84 = arith.constant 0 : index
    %200 = vector.load %arg7[%c0_83, %c0_84] : memref<1x3xf32, #tpu.memory_space<vmem>>, vector<1x3xf32>
    %201 = vector.broadcast %200 : vector<1x3xf32> to vector<16x3xf32>
    %202 = arith.addf %199, %201 : vector<16x3xf32>
    %203 = vector.shape_cast %202 : vector<16x3xf32> to vector<2x8x3xf32>
    %c0_85 = arith.constant 0 : index
    %c0_86 = arith.constant 0 : index
    %c0_87 = arith.constant 0 : index
    %204 = vector.load %arg8[%c0_85, %c0_86, %c0_87] : memref<2x8x3xf32, #tpu.memory_space<vmem>>, vector<2x8x3xf32>
    tpu.vector_store %arg8[%c0_85, %c0_86, %c0_87], %203 {strides = array<i32>} : memref<2x8x3xf32, #tpu.memory_space<vmem>>, vector<2x8x3xf32>,
    return
  }
  func.func @transform_0(%arg0: i32, %arg1: i32) -> (i32, i32, i32) {
    %c0_i32 = arith.constant 0 : i32
    %c0_i32_0 = arith.constant 0 : i32
    return %arg0, %arg1, %c0_i32 : i32, i32, i32
  }
  func.func @transform_1(%arg0: i32, %arg1: i32) -> (i32, i32) {
    %c0_i32 = arith.constant 0 : i32
    %c0_i32_0 = arith.constant 0 : i32
    %c0_i32_1 = arith.constant 0 : i32
    return %c0_i32, %c0_i32_0 : i32, i32
  }
  func.func @transform_2(%arg0: i32, %arg1: i32) -> (i32, i32) {
    %c0_i32 = arith.constant 0 : i32
    %c0_i32_0 = arith.constant 0 : i32
    %c0_i32_1 = arith.constant 0 : i32
    return %c0_i32, %c0_i32_0 : i32, i32
  }
  func.func @transform_3(%arg0: i32, %arg1: i32) -> (i32, i32) {
    %c0_i32 = arith.constant 0 : i32
    %c0_i32_0 = arith.constant 0 : i32
    %c0_i32_1 = arith.constant 0 : i32
    return %c0_i32, %c0_i32_0 : i32, i32
  }
  func.func @transform_4(%arg0: i32, %arg1: i32) -> (i32, i32) {
    %c0_i32 = arith.constant 0 : i32
    %c0_i32_0 = arith.constant 0 : i32
    %c0_i32_1 = arith.constant 0 : i32
    return %c0_i32, %c0_i32_0 : i32, i32
  }
  func.func @transform_5(%arg0: i32, %arg1: i32) -> (i32, i32) {
    %c0_i32 = arith.constant 0 : i32
    %c0_i32_0 = arith.constant 0 : i32
    %c0_i32_1 = arith.constant 0 : i32
    return %c0_i32, %c0_i32_0 : i32, i32
  }
  func.func @transform_6(%arg0: i32, %arg1: i32) -> (i32, i32, i32) {
    %c0_i32 = arith.constant 0 : i32
    %c0_i32_0 = arith.constant 0 : i32
    return %arg0, %arg1, %c0_i32 : i32, i32, i32
  }
}

</mosaic_0001>

<bundles_post_ra>
// kernel: tpu_custom_call.1
= control target key start
LH: loop header
LB: loop body
LE: loop exit
PB: predicated region body
PF: predicated region fallthrough
CT: control target
= control target key end

     0   :  { %s2450_s21 = smov 0   ;;  %s2452_s22 = smov 0   ;;  %s2808_s0 = inlined_call_operand.vmem [shape: f32[2,16,4], index: 0, kind: input, shape index: {}]   ;;  %s2809_s1 = inlined_call_operand.vmem [shape: f32[4,128], index: 1, kind: input, shape index: {}]   ;;  %s2810_s2 = inlined_call_operand.vmem [shape: f32[32,128], index: 2, kind: input, shape index: {}]   ;;  %s2811_s3 = inlined_call_operand.vmem [shape: f32[1,128], index: 3, kind: input, shape index: {}]   ;;  %s2812_s4 = inlined_call_operand.vmem [shape: f32[32,3], index: 4, kind: input, shape index: {}]   ;;  %s2813_s5 = inlined_call_operand.vmem [shape: f32[1,3], index: 5, kind: input, shape index: {}]   ;;  %s2814_s6 = inlined_call_operand.vmem [shape: f32[2,16,3], index: 6, kind: output, shape index: {}]  }
   0x1   :  { %s2454_s23 = smov 0   ;;  %s2456_s24 = smov 0  }
   0x2   :  { %s2458_s25 = smov 0  }
   0x3 LB: > { %s25_s26 = sadd.s32 1, %s2401_s24  ;;  %s1953_s27 = sadd.s32 4294967295, %s2405_s25   ;;  %s2405_s25 = sphi %s2458_s25, %s16_s25   ;;  %s2401_s24 = sphi %s2456_s24, %s2819_s24   ;;  %s2397_s23 = sphi %s2454_s23, %s2818_s23   ;;  %s2393_s22 = sphi %s2452_s22, %s2817_s22   ;;  %s2389_s21 = sphi %s2450_s21, %s2816_s21  }
   0x4   : > { %p26_p0 = scmp.ge.s32.totalorder %s25_s26, 2  ;;  %p44_p1 = scmp.ne.s32.totalorder %s2393_s22, %s2389_s21 }
   0x5   : > { %p45_p2 = scmp.eq.s32.totalorder %s2405_s25, 0  ;;  %p181_p4 = scmp.eq.s32.totalorder %s1953_s27, 1 }
   0x6   : > { %s2821_s26 = smov (%p26_p0, %s25_s26), 0  ;;  %s37_s29 = sadd.s32 1, %s2393_s22 }
   0x7   : > { %p46_p3 = por %p45_p2, %p44_p1  ;;  %s33_s28 = ssub.s32 %s2401_s24, %s2821_s26 }
   0x8   : > { %p35_p5 = scmp.eq.s32.totalorder %s33_s28, 0  ;;  %p2485_p6 = por %p181_p4, %p44_p1 }
   0x9   : > { %p1956_p7 = scmp.ge.s32.totalorder %s2405_s25, 2 }
   0xa   : > { %s2490_s7 = scalar_select %p35_p5, %s2393_s22, %s37_s29  }
   0xb   : > { %218 = sbr.rel (%p1956_p7) target bundleno = 25 (0x19), region = 36 }
  0x12   : > { %221 = sbr.rel (!%p46_p3) target bundleno = 25 (0x19), region = 40  ;;  %s223_s8 = sand.u32 (%p46_p3), 1, %s2393_s22  }
  0x13   : > { %s1958_s9 = sshll.u32 (%p46_p3), %s2401_s24, 3  ;;  %s1957_s10 = sshll.u32 (%p46_p3), %s223_s8, 4 }
  0x14   : > { %s230_s13 = scalar_lea.vmem (%p46_p3), %s2808_s0, %s1958_s9  ;;  %s225_s14 = scalar_lea.vmem (%p46_p3), [#allocation6], %s1957_s10 }
  0x15   : > { %v260_v0 = vld [vmem:[%s230_s13] sm:$0xff] (%p46_p3)  ;;  %v262_v1 = vld [vmem:[%s230_s13 + $0x10] sm:$0xff] (%p46_p3) }
  0x16   : > { %261 = vst [vmem:[%s225_s14] sm:$0xff] (%p46_p3), %v260_v0  ;;  %263 = vst [vmem:[%s225_s14 + $0x8] sm:$0xff] (%p46_p3), %v262_v1 }
  0x19 PF: > { %p1959_p8 = scmp.ge.s32.totalorder %s2405_s25, 1  ;;  %p268_p9 = scmp.lt.s32.totalorder %s2405_s25, 3 }
  0x1b   : > { %p269_p10 = pnand %p1959_p8, %p268_p9 }
  0x1c   : > { %s275_s15 = sand.u32 (!%p269_p10), 1, %s2389_s21   ;;  %p1962_p11 = scmp.ne.s32.totalorder (!%p269_p10), %s2397_s23, 0 }
  0x1d   : > { %272 = sbr.rel (%p269_p10) target bundleno = 6081 (0x17c1), region = 78  ;;  %s1960_s16 = sshll.u32 (!%p269_p10), %s275_s15, 4 }
  0x1e   : > { %s277_s17 = scalar_lea.vmem (!%p269_p10), [#allocation6], %s1960_s16  ;;  %s2501_s18 = scalar_lea.vmem (!%p269_p10), [#allocation7], %s1960_s16 }
  0x24   : > { %308 = sbr.rel (%p1962_p11) target bundleno = 43 (0x2b), region = 86  ;;  %vm309_vm0 = vcmask (!%p1962_p11), 254976   ;;  %v2407_v2 = vmov (!%p1962_p11), 0.0  }
  0x25   : > { %310 = vst.msk [vmem:[#allocation4] sm:$0x3] (!%p1962_p11), %vm309_vm0, %v2407_v2  ;;  %311 = vst.msk [vmem:[#allocation5] sm:$0x3] (!%p1962_p11), %vm309_vm0, %v2407_v2 }
  0x2b PF: > { %v314_v3 = vld [vmem:[%s2809_s1] sm:$0xf]  ;;  %vm329_vm1 = vcmask 1043456   ;;  %v312_v4 = vld [vmem:[%s277_s17] sm:$0xff]  ;;  %vm322_vm2 = vcmask 31744   ;;  %v2408_v8 = vmov 0.0|0.0   ;;  %v416_v33 = vlaneseq }
  0x2c   : > { %2047 = vmatprep.subr.msk.mxu0 %vm329_vm1, %v314_v3  ;;  %2049 = vmatprep.mubr.msk.f32.mxu0 %vm322_vm2, %v312_v4  ;;  %v313_v5 = vld [vmem:[%s277_s17 + $0x8] sm:$0xff]  ;;  %vm2409_vm3 = vmmov 0   ;;  %v2410_v12 = vmov 0.0   ;;  %vm421_vm4 = vcmask 261120   ;;  %vm518_vm5 = vcmask 1041409   ;;  %s2411_s14 = smov 32  }
  0x2d   : > { %v410_v6 = vld [vmem:[%s2810_s2] sm:$0xff]  ;;  %v411_v7 = vld [vmem:[%s2810_s2 + $0x8] sm:$0xff]  ;;  %2048 = vmatpush3.msk.msra.mxu0 %vm329_vm1, %v314_v3  ;;  %2151 = vmatprep.subr.bf16.mxu1 %v2408_v8  ;;  %v412_v10 = vld [vmem:[%s2810_s2 + $0x10] sm:$0xff]  ;;  %v2548_v35 = vand.u32 127, %v416_v33  ;;  %s2412_s15 = smov 64   ;;  %vm585_vm7 = vcmask 253952  }
  0x2e   : > { %v2514_v9 = vpack.c.bf16 %v411_v7, %v410_v6  ;;  %v413_v11 = vld [vmem:[%s2810_s2 + $0x18] sm:$0xff]  ;;  %2050 = vmatmul.mubr.msk.f32.vlgmr.msra.gmra.mrb[0].mxu0 %vm322_vm2, %v313_v5  ;;  %2060 = vmatprep.mubr.msk.f32.mxu1 %vm2409_vm3, %v2410_v12  ;;  %v414_v14 = vld [vmem:[#allocation4] sm:$0x3]  ;;  %v415_v44 = vld [vmem:[#allocation5] sm:$0x3]  ;;  %s2414_s8 = smov 96  }
  0x2f   : > { %v2525_v13 = vpack.c.bf16 %v413_v11, %v412_v10  ;;  %2157 = vmatprep.subr.bf16.mxu0 %v2408_v8  ;;  %2071 = vmatprep.mubr.msk.f32.mxu0 %vm2409_vm3, %v2410_v12  ;;  %v1963_v15 = vld [vmem:[%s2811_s3] ss:$0 sm:$0xff]  ;;  %vm418_vm6 = vcmp.lt.s32.totalorder %v2548_v35, 96  ;;  %vm1732_vm8 = vcmask 254976   ;;  %vm1833_vm9 = vcmask 23552   ;;  %s1995_s11 = sshll.u32 (%p2485_p6), %s2397_s23, 3 }
  0x30   : > { %2153 = vmatpush3.bf16.msra.mxu1 %v2514_v9  ;;  %2159 = vmatpush3.bf16.msra.mxu0 %v2514_v9 }
  0x31   : > { %2154 = vmatprep.subr.bf16.mxu1 %v2408_v8  ;;  %2160 = vmatprep.subr.bf16.mxu0 %v2408_v8 }
  0x34   : > { %2156 = vmatpush3.bf16.msra.mxu1 %v2525_v13  ;;  %2162 = vmatpush3.bf16.msra.mxu0 %v2525_v13 }
  0x35   : > { %2163 = vmatprep.subr.bf16.mxu1 %v2408_v8  ;;  %2169 = vmatprep.subr.bf16.mxu0 %v2408_v8 }
  0x37   : > { %2061 = vmatmul.mubr.msk.f32.vlgmr.msra.gmra.mrb[0].mxu1 %vm421_vm4, %v414_v14 }
  0x38   : > { %2165 = vmatpush3.bf16.msra.mxu1 %v2514_v9  ;;  %2082 = vmatprep.mubr.msk.f32.mxu1 %vm2409_vm3, %v2410_v12 }
  0x39   : > { %2166 = vmatprep.subr.bf16.mxu1 %v2408_v8 }
  0x3c   : > { %2168 = vmatpush3.bf16.msra.mxu1 %v2525_v13 }
  0x3d   : > { %2175 = vmatprep.subr.bf16.mxu1 %v2408_v8 }
 0x101   : > { %v2051_v16 = vpop.f32.mrb[0].mxu0 }
 0x102   : > { %v405_v17 = vadd.f32 %v2051_v16, %v1963_v15  ;;  %v399_v18 = vpop.f32.mrb[1].mxu0 }
 0x103   : > { %v400_v19 = vadd.f32 %v1963_v15, %v399_v18 }
 0x104   : > { %409 = vst [vmem:[#allocation2 + $0x8] sm:$0xff] %v405_v17 }
 0x105   : > { %408 = vst [vmem:[#allocation2] sm:$0xff] %v400_v19 }
 0x10a   : > { %v491_v20 = vpop.f32.mrb[0].mxu1 }
 0x10b   : > { %v496_v21 = vrot.slane %v491_v20, 1  ;;  %v2062_v22 = vpop.f32.mrb[1].mxu1  ;;  %v420_v23 = vld [vmem:[#allocation2 + $0x8] sm:$0x1]  ;;  %v589_v60 = vld [vmem:[#allocation2 + $0x9] sm:$0x1] }
 0x10c   : > { %v419_v24 = vld [vmem:[#allocation2] sm:$0x1]  ;;  %v588_v55 = vld [vmem:[#allocation2 + $0x1] sm:$0x1] }
 0x10d   : > { %v500_v25 = vadd.f32 %v496_v21, %v420_v23  ;;  %v499_v26 = vadd.f32 %v491_v20, %v419_v24 }
 0x10f   : > { %v1969_v27 = vmul.f32 -1.442695, %v500_v25  ;;  %v1968_v28 = vmul.f32 -1.442695, %v499_v26 }
 0x111   : > { %2255 = vpow2.f32 %v1969_v27 }
 0x112   : > { %2257 = vpow2.f32 %v1968_v28 }
 0x113   : > { %2259 = vtanh.f32 %v500_v25 }
 0x114   : > { %2261 = vtanh.f32 %v499_v26  ;;  %v751_v26 = vld [vmem:[#allocation2 + $0x2] sm:$0x1] }
 0x11b   : > { %v2256_v29 = vpop.eup %2255 }
 0x11c   : > { %v2258_v30 = vpop.eup %2257  ;;  %v508_v31 = vadd.f32 1.0, %v2256_v29 }
 0x11d   : > { %v507_v32 = vadd.f32 1.0, %v2258_v30  ;;  %v2260_v34 = vpop.eup %2259 }
 0x11e   : > { %2263 = vrcp.f32 %v508_v31  ;;  %v2262_v36 = vpop.eup %2261  ;;  %v523_v37 = vrot.slane %v2260_v34, 7  ;;  %v752_v31 = vld [vmem:[#allocation2 + $0xa] sm:$0x1] }
 0x11f   : > { %2265 = vrcp.f32 %v507_v32 }
 0x120   : > { %v524_v42 = vsel %vm518_vm5, %v523_v37, %v2262_v36 }
 0x128   : > { %v2264_v38 = vpop.eup %2263 }
 0x129   : > { %v2266_v39 = vpop.eup %2265  ;;  %v517_v40 = vrot.slane %v2264_v38, 7 }
 0x12b   : > { %v519_v41 = vsel %vm518_vm5, %v517_v40, %v2266_v39 }
 0x12c   : > { %v526_v43 = vsel %vm418_vm6, %v519_v41, %v524_v42 }
 0x12d   : > { %533 = vrot.lane.b32.xlu0 %v526_v43, %s2411_s14 }
 0x131   : > { %528 = vrot.lane.b32.xlu0 %v415_v44, %s2411_s14 }
 0x19f   : > { %v534_v45 = vpop.permute.xlu0 %533 }
 0x1a0   : > { %v536_v46 = vmul.f32 %v534_v45, %v526_v43 }
 0x1a2   : > { %538 = vrot.lane.b32.xlu1 %v536_v46, %s2411_s14 }
 0x1a3   : > { %v529_v47 = vpop.permute.xlu0 %528 }
 0x1a4   : > { %v531_v48 = vmul.f32 %v529_v47, %v526_v43 }
 0x214   : > { %v539_v49 = vpop.permute.xlu1 %538 }
 0x215   : > { %v541_v50 = vadd.f32 %v539_v49, %v531_v48 }
 0x217   : > { %2267 = vtanh.f32 %v541_v50 }
 0x221   : > { %v2268_v51 = vpop.eup %2267 }
 0x222   : > { %544 = vrot.lane.b32.xlu1 %v2268_v51, %s2411_s14 }
 0x294   : > { %v545_v52 = vpop.permute.xlu1 %544 }
 0x295   : > { %v2559_v53 = vmul.f32 %v545_v52, %v526_v43 }
 0x297   : > { %590 = vrot.lane.b32.xlu0 %v2559_v53, %s2412_s15 }
 0x309   : > { %v591_v54 = vpop.permute.xlu0 %590 }
 0x30a   : > { %2072 = vmatmul.mubr.msk.f32.vlgmr.msra.gmra.mrb[2].mxu0 %vm421_vm4, %v591_v54 }
 0x30b   : > { %2171 = vmatpush3.bf16.msra.mxu0 %v2514_v9  ;;  %2093 = vmatprep.mubr.msk.f32.mxu0 %vm2409_vm3, %v2410_v12 }
 0x30c   : > { %2172 = vmatprep.subr.bf16.mxu0 %v2408_v8 }
 0x30f   : > { %2174 = vmatpush3.bf16.msra.mxu0 %v2525_v13 }
 0x310   : > { %2181 = vmatprep.subr.bf16.mxu0 %v2408_v8 }
 0x3dd   : > { %v660_v56 = vpop.f32.mrb[2].mxu0 }
 0x3de   : > { %v665_v57 = vrot.slane %v660_v56, 1  ;;  %v668_v58 = vadd.f32 %v660_v56, %v588_v55  ;;  %v2073_v59 = vpop.f32.mrb[3].mxu0 }
 0x3e0   : > { %v669_v61 = vadd.f32 %v665_v57, %v589_v60  ;;  %v1971_v62 = vmul.f32 -1.442695, %v668_v58  ;;  %v914_v60 = vld [vmem:[#allocation2 + $0x3] sm:$0x1] }
 0x3e2   : > { %2269 = vpow2.f32 %v1971_v62  ;;  %v1972_v63 = vmul.f32 -1.442695, %v669_v61 }
 0x3e4   : > { %2271 = vpow2.f32 %v1972_v63 }
 0x3e5   : > { %2273 = vtanh.f32 %v669_v61 }
 0x3ec   : > { %v2270_v0 = vpop.eup %2269 }
 0x3ed   : > { %v676_v2 = vadd.f32 1.0, %v2270_v0 }
 0x3ee   : > { %v2272_v1 = vpop.eup %2271 }
 0x3ef   : > { %v677_v3 = vadd.f32 1.0, %v2272_v1  ;;  %v2274_v4 = vpop.eup %2273  ;;  %v915_v1 = vld [vmem:[#allocation2 + $0xb] sm:$0x1] }
 0x3f0   : > { %v691_v5 = vrot.slane %v2274_v4, 7 }
 0x3f1   : > { %2275 = vrcp.f32 %v677_v3 }
 0x3f2   : > { %2277 = vtanh.f32 %v668_v58 }
 0x3f3   : > { %2279 = vrcp.f32 %v676_v2 }
 0x3fb   : > { %v2276_v6 = vpop.eup %2275 }
 0x3fc   : > { %v2278_v7 = vpop.eup %2277  ;;  %v686_v10 = vrot.slane %v2276_v6, 7 }
 0x3fd   : > { %v2280_v11 = vpop.eup %2279  ;;  %v692_v15 = vsel %vm518_vm5, %v691_v5, %v2278_v7 }
 0x3fe   : > { %v687_v14 = vsel %vm518_vm5, %v686_v10, %v2280_v11 }
 0x3ff   : > { %v694_v16 = vsel %vm418_vm6, %v687_v14, %v692_v15 }
 0x400   : > { %697 = vrot.lane.b32.xlu1 %v694_v16, %s2411_s14  ;;  %v695_v19 = vmul.f32 %v694_v16, %v541_v50 }
 0x472   : > { %v698_v17 = vpop.permute.xlu1 %697 }
 0x473   : > { %v700_v18 = vmul.f32 %v698_v17, %v694_v16 }
 0x475   : > { %702 = vrot.lane.b32.xlu0 %v700_v18, %s2411_s14 }
 0x4e7   : > { %v703_v20 = vpop.permute.xlu0 %702 }
 0x4e8   : > { %v705_v21 = vadd.f32 %v703_v20, %v695_v19 }
 0x4ea   : > { %2281 = vtanh.f32 %v705_v21 }
 0x4f4   : > { %v2282_v22 = vpop.eup %2281 }
 0x4f5   : > { %708 = vrot.lane.b32.xlu1 %v2282_v22, %s2411_s14 }
 0x567   : > { %v709_v23 = vpop.permute.xlu1 %708 }
 0x568   : > { %v2577_v24 = vmul.f32 %v709_v23, %v694_v16 }
 0x56a   : > { %753 = vrot.lane.b32.xlu0 %v2577_v24, %s2412_s15 }
 0x5dc   : > { %v754_v25 = vpop.permute.xlu0 %753 }
 0x5dd   : > { %2083 = vmatmul.mubr.msk.f32.vlgmr.msra.gmra.mrb[2].mxu1 %vm421_vm4, %v754_v25 }
 0x5de   : > { %2177 = vmatpush3.bf16.msra.mxu1 %v2514_v9  ;;  %2104 = vmatprep.mubr.msk.f32.mxu1 %vm2409_vm3, %v2410_v12 }
 0x5df   : > { %2178 = vmatprep.subr.bf16.mxu1 %v2408_v8 }
 0x5e2   : > { %2180 = vmatpush3.bf16.msra.mxu1 %v2525_v13 }
 0x5e3   : > { %2187 = vmatprep.subr.bf16.mxu1 %v2408_v8 }
 0x6b0   : > { %v823_v27 = vpop.f32.mrb[2].mxu1 }
 0x6b1   : > { %v828_v28 = vrot.slane %v823_v27, 1  ;;  %v831_v29 = vadd.f32 %v823_v27, %v751_v26  ;;  %v2084_v30 = vpop.f32.mrb[3].mxu1 }
 0x6b3   : > { %v832_v32 = vadd.f32 %v828_v28, %v752_v31  ;;  %v1974_v34 = vmul.f32 -1.442695, %v831_v29 }
 0x6b5   : > { %2283 = vpow2.f32 %v1974_v34  ;;  %v1975_v36 = vmul.f32 -1.442695, %v832_v32 }
 0x6b7   : > { %2285 = vpow2.f32 %v1975_v36 }
 0x6b8   : > { %2287 = vtanh.f32 %v832_v32  ;;  %v1077_v32 = vld [vmem:[#allocation2 + $0x4] sm:$0x1] }
 0x6bf   : > { %v2284_v37 = vpop.eup %2283 }
 0x6c0   : > { %v839_v39 = vadd.f32 1.0, %v2284_v37 }
 0x6c1   : > { %v2286_v38 = vpop.eup %2285 }
 0x6c2   : > { %v840_v40 = vadd.f32 1.0, %v2286_v38  ;;  %v2288_v41 = vpop.eup %2287 }
 0x6c3   : > { %v854_v42 = vrot.slane %v2288_v41, 7 }
 0x6c4   : > { %2289 = vrcp.f32 %v840_v40 }
 0x6c5   : > { %2291 = vtanh.f32 %v831_v29 }
 0x6c6   : > { %2293 = vrcp.f32 %v839_v39  ;;  %v1078_v39 = vld [vmem:[#allocation2 + $0xc] sm:$0x1] }
 0x6ce   : > { %v2290_v43 = vpop.eup %2289 }
 0x6cf   : > { %v2292_v44 = vpop.eup %2291  ;;  %v849_v45 = vrot.slane %v2290_v43, 7 }
 0x6d0   : > { %v2294_v46 = vpop.eup %2293  ;;  %v855_v48 = vsel %vm518_vm5, %v854_v42, %v2292_v44 }
 0x6d1   : > { %v850_v47 = vsel %vm518_vm5, %v849_v45, %v2294_v46 }
 0x6d2   : > { %v857_v49 = vsel %vm418_vm6, %v850_v47, %v855_v48 }
 0x6d3   : > { %860 = vrot.lane.b32.xlu1 %v857_v49, %s2411_s14  ;;  %v858_v52 = vmul.f32 %v857_v49, %v705_v21 }
 0x745   : > { %v861_v50 = vpop.permute.xlu1 %860 }
 0x746   : > { %v863_v51 = vmul.f32 %v861_v50, %v857_v49 }
 0x748   : > { %865 = vrot.lane.b32.xlu0 %v863_v51, %s2411_s14 }
 0x7ba   : > { %v866_v54 = vpop.permute.xlu0 %865 }
 0x7bb   : > { %v868_v55 = vadd.f32 %v866_v54, %v858_v52 }
 0x7bd   : > { %2295 = vtanh.f32 %v868_v55 }
 0x7c7   : > { %v2296_v56 = vpop.eup %2295 }
 0x7c8   : > { %871 = vrot.lane.b32.xlu1 %v2296_v56, %s2411_s14 }
 0x83a   : > { %v872_v57 = vpop.permute.xlu1 %871 }
 0x83b   : > { %v2595_v58 = vmul.f32 %v872_v57, %v857_v49 }
 0x83d   : > { %916 = vrot.lane.b32.xlu0 %v2595_v58, %s2412_s15 }
 0x8af   : > { %v917_v59 = vpop.permute.xlu0 %916 }
 0x8b0   : > { %2094 = vmatmul.mubr.msk.f32.vlgmr.msra.gmra.mrb[4].mxu0 %vm421_vm4, %v917_v59 }
 0x8b1   : > { %2183 = vmatpush3.bf16.msra.mxu0 %v2514_v9  ;;  %2115 = vmatprep.mubr.msk.f32.mxu0 %vm2409_vm3, %v2410_v12 }
 0x8b2   : > { %2184 = vmatprep.subr.bf16.mxu0 %v2408_v8 }
 0x8b5   : > { %2186 = vmatpush3.bf16.msra.mxu0 %v2525_v13 }
 0x8b6   : > { %2193 = vmatprep.subr.bf16.mxu0 %v2408_v8 }
 0x983   : > { %v986_v61 = vpop.f32.mrb[4].mxu0 }
 0x984   : > { %v991_v62 = vrot.slane %v986_v61, 1  ;;  %v994_v63 = vadd.f32 %v986_v61, %v914_v60  ;;  %v2095_v0 = vpop.f32.mrb[5].mxu0 }
 0x986   : > { %v995_v2 = vadd.f32 %v991_v62, %v915_v1  ;;  %v1977_v3 = vmul.f32 -1.442695, %v994_v63 }
 0x988   : > { %2297 = vpow2.f32 %v1977_v3  ;;  %v1978_v4 = vmul.f32 -1.442695, %v995_v2  ;;  %v1240_v3 = vld [vmem:[#allocation2 + $0x5] sm:$0x1] }
 0x98a   : > { %2299 = vpow2.f32 %v1978_v4 }
 0x98b   : > { %2301 = vtanh.f32 %v995_v2 }
 0x992   : > { %v2298_v5 = vpop.eup %2297 }
 0x993   : > { %v1002_v7 = vadd.f32 1.0, %v2298_v5 }
 0x994   : > { %v2300_v6 = vpop.eup %2299 }
 0x995   : > { %v1003_v10 = vadd.f32 1.0, %v2300_v6  ;;  %v2302_v11 = vpop.eup %2301 }
 0x996   : > { %v1017_v14 = vrot.slane %v2302_v11, 7 }
 0x997   : > { %2303 = vrcp.f32 %v1003_v10  ;;  %v1241_v10 = vld [vmem:[#allocation2 + $0xd] sm:$0x1] }
 0x998   : > { %2305 = vtanh.f32 %v994_v63 }
 0x999   : > { %2307 = vrcp.f32 %v1002_v7 }
 0x9a1   : > { %v2304_v15 = vpop.eup %2303 }
 0x9a2   : > { %v2306_v16 = vpop.eup %2305  ;;  %v1012_v17 = vrot.slane %v2304_v15, 7 }
 0x9a3   : > { %v2308_v18 = vpop.eup %2307  ;;  %v1018_v20 = vsel %vm518_vm5, %v1017_v14, %v2306_v16 }
 0x9a4   : > { %v1013_v19 = vsel %vm518_vm5, %v1012_v17, %v2308_v18 }
 0x9a5   : > { %v1020_v21 = vsel %vm418_vm6, %v1013_v19, %v1018_v20 }
 0x9a6   : > { %1023 = vrot.lane.b32.xlu1 %v1020_v21, %s2411_s14  ;;  %v1021_v25 = vmul.f32 %v1020_v21, %v868_v55 }
 0xa18   : > { %v1024_v22 = vpop.permute.xlu1 %1023 }
 0xa19   : > { %v1026_v23 = vmul.f32 %v1024_v22, %v1020_v21 }
 0xa1b   : > { %1028 = vrot.lane.b32.xlu0 %v1026_v23, %s2411_s14 }
 0xa8d   : > { %v1029_v26 = vpop.permute.xlu0 %1028 }
 0xa8e   : > { %v1031_v27 = vadd.f32 %v1029_v26, %v1021_v25 }
 0xa90   : > { %2309 = vtanh.f32 %v1031_v27 }
 0xa9a   : > { %v2310_v28 = vpop.eup %2309 }
 0xa9b   : > { %1034 = vrot.lane.b32.xlu1 %v2310_v28, %s2411_s14 }
 0xb0d   : > { %v1035_v29 = vpop.permute.xlu1 %1034 }
 0xb0e   : > { %v2613_v30 = vmul.f32 %v1035_v29, %v1020_v21 }
 0xb10   : > { %1079 = vrot.lane.b32.xlu0 %v2613_v30, %s2412_s15 }
 0xb82   : > { %v1080_v31 = vpop.permute.xlu0 %1079 }
 0xb83   : > { %2105 = vmatmul.mubr.msk.f32.vlgmr.msra.gmra.mrb[4].mxu1 %vm421_vm4, %v1080_v31 }
 0xb84   : > { %2189 = vmatpush3.bf16.msra.mxu1 %v2514_v9  ;;  %2126 = vmatprep.mubr.msk.f32.mxu1 %vm2409_vm3, %v2410_v12 }
 0xb85   : > { %2190 = vmatprep.subr.bf16.mxu1 %v2408_v8 }
 0xb88   : > { %2192 = vmatpush3.bf16.msra.mxu1 %v2525_v13 }
 0xc56   : > { %v1149_v34 = vpop.f32.mrb[4].mxu1 }
 0xc57   : > { %v1154_v36 = vrot.slane %v1149_v34, 1  ;;  %v1157_v37 = vadd.f32 %v1149_v34, %v1077_v32  ;;  %v2106_v38 = vpop.f32.mrb[5].mxu1 }
 0xc58   : > { %v1403_v38 = vld [vmem:[#allocation2 + $0x6] sm:$0x1] }
 0xc59   : > { %v1158_v40 = vadd.f32 %v1154_v36, %v1078_v39  ;;  %v1980_v41 = vmul.f32 -1.442695, %v1157_v37 }
 0xc5b   : > { %2311 = vpow2.f32 %v1980_v41  ;;  %v1981_v42 = vmul.f32 -1.442695, %v1158_v40 }
 0xc5d   : > { %2313 = vpow2.f32 %v1981_v42 }
 0xc5e   : > { %2315 = vtanh.f32 %v1158_v40 }
 0xc65   : > { %v2312_v43 = vpop.eup %2311 }
 0xc66   : > { %v1165_v45 = vadd.f32 1.0, %v2312_v43  ;;  %v1404_v43 = vld [vmem:[#allocation2 + $0xe] sm:$0x1] }
 0xc67   : > { %v2314_v44 = vpop.eup %2313 }
 0xc68   : > { %v1166_v46 = vadd.f32 1.0, %v2314_v44  ;;  %v2316_v47 = vpop.eup %2315 }
 0xc69   : > { %v1180_v48 = vrot.slane %v2316_v47, 7 }
 0xc6a   : > { %2317 = vrcp.f32 %v1166_v46 }
 0xc6b   : > { %2319 = vtanh.f32 %v1157_v37 }
 0xc6c   : > { %2321 = vrcp.f32 %v1165_v45 }
 0xc74   : > { %v2318_v49 = vpop.eup %2317 }
 0xc75   : > { %v2320_v50 = vpop.eup %2319  ;;  %v1175_v51 = vrot.slane %v2318_v49, 7 }
 0xc76   : > { %v2322_v52 = vpop.eup %2321  ;;  %v1181_v55 = vsel %vm518_vm5, %v1180_v48, %v2320_v50 }
 0xc77   : > { %v1176_v54 = vsel %vm518_vm5, %v1175_v51, %v2322_v52 }
 0xc78   : > { %v1183_v56 = vsel %vm418_vm6, %v1176_v54, %v1181_v55 }
 0xc79   : > { %1186 = vrot.lane.b32.xlu1 %v1183_v56, %s2411_s14  ;;  %v1184_v60 = vmul.f32 %v1183_v56, %v1031_v27 }
 0xceb   : > { %v1187_v57 = vpop.permute.xlu1 %1186 }
 0xcec   : > { %v1189_v59 = vmul.f32 %v1187_v57, %v1183_v56 }
 0xcee   : > { %1191 = vrot.lane.b32.xlu0 %v1189_v59, %s2411_s14 }
 0xd60   : > { %v1192_v61 = vpop.permute.xlu0 %1191 }
 0xd61   : > { %v1194_v62 = vadd.f32 %v1192_v61, %v1184_v60 }
 0xd63   : > { %2323 = vtanh.f32 %v1194_v62 }
 0xd6d   : > { %v2324_v63 = vpop.eup %2323 }
 0xd6e   : > { %1197 = vrot.lane.b32.xlu1 %v2324_v63, %s2411_s14 }
 0xde0   : > { %v1198_v0 = vpop.permute.xlu1 %1197 }
 0xde1   : > { %v2630_v1 = vmul.f32 %v1198_v0, %v1183_v56 }
 0xde3   : > { %1242 = vrot.lane.b32.xlu0 %v2630_v1, %s2412_s15 }
 0xe55   : > { %v1243_v2 = vpop.permute.xlu0 %1242 }
 0xe56   : > { %2116 = vmatmul.mubr.msk.f32.vlgmr.msra.gmra.mrb[6].mxu0 %vm421_vm4, %v1243_v2 }
 0xe57   : > { %2195 = vmatpush3.bf16.msra.mxu0 %v2514_v9  ;;  %2137 = vmatprep.mubr.msk.f32.mxu0 %vm2409_vm3, %v2410_v12 }
 0xe58   : > { %2196 = vmatprep.subr.bf16.mxu0 %v2408_v8 }
 0xe5b   : > { %2198 = vmatpush3.bf16.msra.mxu0 %v2525_v13 }
 0xf29   : > { %v1312_v4 = vpop.f32.mrb[6].mxu0 }
 0xf2a   : > { %v1317_v5 = vrot.slane %v1312_v4, 1  ;;  %v1320_v6 = vadd.f32 %v1312_v4, %v1240_v3  ;;  %v2117_v7 = vpop.f32.mrb[7].mxu0 }
 0xf2c   : > { %v1321_v11 = vadd.f32 %v1317_v5, %v1241_v10  ;;  %v1983_v14 = vmul.f32 -1.442695, %v1320_v6  ;;  %v1566_v10 = vld [vmem:[#allocation2 + $0x7] sm:$0x1] }
 0xf2e   : > { %2325 = vpow2.f32 %v1983_v14  ;;  %v1984_v15 = vmul.f32 -1.442695, %v1321_v11 }
 0xf30   : > { %2327 = vpow2.f32 %v1984_v15 }
 0xf31   : > { %2329 = vtanh.f32 %v1321_v11 }
 0xf38   : > { %v2326_v16 = vpop.eup %2325 }
 0xf39   : > { %v1328_v17 = vadd.f32 1.0, %v2326_v16 }
 0xf3a   : > { %v2328_v9 = vpop.eup %2327 }
 0xf3b   : > { %v1329_v12 = vadd.f32 1.0, %v2328_v9  ;;  %v2330_v8 = vpop.eup %2329  ;;  %v1567_v9 = vld [vmem:[#allocation2 + $0xf] sm:$0x1] }
 0xf3c   : > { %v1343_v13 = vrot.slane %v2330_v8, 7 }
 0xf3d   : > { %2331 = vrcp.f32 %v1329_v12 }
 0xf3e   : > { %2333 = vtanh.f32 %v1320_v6 }
 0xf3f   : > { %2335 = vrcp.f32 %v1328_v17 }
 0xf47   : > { %v2332_v18 = vpop.eup %2331 }
 0xf48   : > { %v2334_v19 = vpop.eup %2333  ;;  %v1338_v20 = vrot.slane %v2332_v18, 7 }
 0xf49   : > { %v2336_v21 = vpop.eup %2335  ;;  %v1344_v23 = vsel %vm518_vm5, %v1343_v13, %v2334_v19 }
 0xf4a   : > { %v1339_v22 = vsel %vm518_vm5, %v1338_v20, %v2336_v21 }
 0xf4b   : > { %v1346_v25 = vsel %vm418_vm6, %v1339_v22, %v1344_v23 }
 0xf4c   : > { %1349 = vrot.lane.b32.xlu1 %v1346_v25, %s2411_s14  ;;  %v1347_v28 = vmul.f32 %v1346_v25, %v1194_v62 }
 0xfbe   : > { %v1350_v26 = vpop.permute.xlu1 %1349 }
 0xfbf   : > { %v1352_v27 = vmul.f32 %v1350_v26, %v1346_v25 }
 0xfc1   : > { %1354 = vrot.lane.b32.xlu0 %v1352_v27, %s2411_s14 }
0x1033   : > { %v1355_v29 = vpop.permute.xlu0 %1354 }
0x1034   : > { %v1357_v31 = vadd.f32 %v1355_v29, %v1347_v28 }
0x1036   : > { %2337 = vtanh.f32 %v1357_v31 }
0x1040   : > { %v2338_v32 = vpop.eup %2337 }
0x1041   : > { %1360 = vrot.lane.b32.xlu1 %v2338_v32, %s2411_s14  ;;  %v2413_v32 = vmov 1966171168  }
0x10b3   : > { %v1361_v34 = vpop.permute.xlu1 %1360 }
0x10b4   : > { %v2647_v36 = vmul.f32 %v1361_v34, %v1346_v25  ;;  %v550_v34 = vunpack.c.l.s4 %v2413_v32  ;;  %v1741_v32 = vld [vmem:[%s2812_s4] sm:$0xff] }
0x10b6   : > { %1405 = vrot.lane.b32.xlu0 %v2647_v36, %s2412_s15 }
0x1128   : > { %v1406_v37 = vpop.permute.xlu0 %1405 }
0x1129   : > { %2127 = vmatmul.mubr.msk.f32.vlgmr.msra.gmra.mrb[6].mxu1 %vm421_vm4, %v1406_v37  ;;  %v551_v37 = vunpack.c.0.s8 %v550_v34  ;;  %v1742_v34 = vld [vmem:[%s2812_s4 + $0x8] sm:$0xff] }
0x11fc   : > { %v1475_v39 = vpop.f32.mrb[6].mxu1 }
0x11fd   : > { %v1480_v40 = vrot.slane %v1475_v39, 1  ;;  %v1483_v41 = vadd.f32 %v1475_v39, %v1403_v38  ;;  %v2128_v42 = vpop.f32.mrb[7].mxu1  ;;  %v553_v38 = vshrl.u32 %v416_v33, 7 }
0x11ff   : > { %v1484_v44 = vadd.f32 %v1480_v40, %v1404_v43  ;;  %v1986_v45 = vmul.f32 -1.442695, %v1483_v41  ;;  %v2673_v39 = vsub.s32 %v551_v37, %v553_v38  ;;  %v2677_v42 = vsub.s32 0, %v553_v38 }
0x1200   : > { %v2199_v38 = vpack.c.bf16 %v1742_v34, %v1741_v32 }
0x1201   : > { %2339 = vpow2.f32 %v1986_v45  ;;  %v1987_v46 = vmul.f32 -1.442695, %v1484_v44  ;;  %v555_v40 = vrot.slane %v2559_v53, %v2673_v39  ;;  %v882_v43 = vrot.slane %v2595_v58, %v2673_v39 }
0x1202   : > { %v1208_v33 = vrot.slane %v2630_v1, %v2673_v39  ;;  %2200 = vmatprep.subr.bf16.mxu1 %v2199_v38 }
0x1203   : > { %2341 = vpow2.f32 %v1987_v46  ;;  %v563_v35 = vrot.slane %v555_v40, %v2673_v39  ;;  %v890_v45 = vrot.slane %v882_v43, %v2673_v39  ;;  %v556_v58 = vcombine.high %v555_v40, %v555_v40  ;;  %2202 = vmatpush3.bf16.msra.mxu1 %v2199_v38 }
0x1204   : > { %2343 = vtanh.f32 %v1484_v44  ;;  %v1216_v53 = vrot.slane %v1208_v33, %v2673_v39  ;;  %v883_v1 = vcombine.high %v882_v43, %v882_v43  ;;  %v1744_v43 = vld [vmem:[%s2812_s4 + $0x18] sm:$0xff] }
0x1205   : > { %v574_v46 = vrot.slane %v563_v35, %v2677_v42  ;;  %v1743_v35 = vld [vmem:[%s2812_s4 + $0x10] sm:$0xff] }
0x120b   : > { %v2340_v47 = vpop.eup %2339 }
0x120c   : > { %v1491_v49 = vadd.f32 1.0, %v2340_v47 }
0x120d   : > { %v2342_v48 = vpop.eup %2341 }
0x120e   : > { %v1492_v50 = vadd.f32 1.0, %v2342_v48  ;;  %v2344_v51 = vpop.eup %2343  ;;  %v901_v48 = vrot.slane %v890_v45, %v2677_v42 }
0x120f   : > { %v1506_v52 = vrot.slane %v2344_v51, 7 }
0x1210   : > { %2345 = vrcp.f32 %v1492_v50  ;;  %v1227_v50 = vrot.slane %v1216_v53, %v2677_v42 }
0x1211   : > { %2347 = vtanh.f32 %v1483_v41 }
0x1212   : > { %2349 = vrcp.f32 %v1491_v49 }
0x121a   : > { %v2346_v54 = vpop.eup %2345 }
0x121b   : > { %v2348_v55 = vpop.eup %2347  ;;  %v1501_v56 = vrot.slane %v2346_v54, 7  ;;  %v1209_v54 = vcombine.high %v1208_v33, %v1208_v33 }
0x121c   : > { %v2350_v57 = vpop.eup %2349  ;;  %v1507_v60 = vsel %vm518_vm5, %v1506_v52, %v2348_v55  ;;  %v570_v52 = vrot.slane %v556_v58, %v2673_v39 }
0x121d   : > { %v1502_v59 = vsel %vm518_vm5, %v1501_v56, %v2350_v57  ;;  %v897_v56 = vrot.slane %v883_v1, %v2673_v39 }
0x121e   : > { %v1509_v61 = vsel %vm418_vm6, %v1502_v59, %v1507_v60  ;;  %v578_v55 = vrot.slane %v570_v52, %v2677_v42  ;;  %v1223_v60 = vrot.slane %v1209_v54, %v2673_v39 }
0x121f   : > { %1512 = vrot.lane.b32.xlu1 %v1509_v61, %s2411_s14  ;;  %v1510_v0 = vmul.f32 %v1509_v61, %v1357_v31  ;;  %v905_v59 = vrot.slane %v897_v56, %v2677_v42 }
0x1291   : > { %v1513_v62 = vpop.permute.xlu1 %1512 }
0x1292   : > { %v1515_v63 = vmul.f32 %v1513_v62, %v1509_v61 }
0x1294   : > { %1517 = vrot.lane.b32.xlu0 %v1515_v63, %s2411_s14 }
0x1306   : > { %v1518_v2 = vpop.permute.xlu0 %1517 }
0x1307   : > { %v2658_v3 = vadd.f32 %v1518_v2, %v1510_v0 }
0x1309   : > { %2351 = vtanh.f32 %v2658_v3 }
0x1313   : > { %v2352_v4 = vpop.eup %2351 }
0x1314   : > { %1523 = vrot.lane.b32.xlu1 %v2352_v4, %s2411_s14 }
0x1386   : > { %v1524_v5 = vpop.permute.xlu1 %1523 }
0x1387   : > { %v1526_v6 = vmul.f32 %v1524_v5, %v1509_v61  ;;  %v1231_v61 = vrot.slane %v1223_v60, %v2677_v42 }
0x1389   : > { %1568 = vrot.lane.b32.xlu0 %v1526_v6, %s2412_s15  ;;  %v1534_v47 = vrot.slane %v1526_v6, %v2673_v39  ;;  %v719_v6 = vrot.slane %v2577_v24, %v2673_v39 }
0x138b   : > { %v1542_v49 = vrot.slane %v1534_v47, %v2673_v39  ;;  %v1535_v57 = vcombine.high %v1534_v47, %v1534_v47 }
0x138d   : > { %v1553_v51 = vrot.slane %v1542_v49, %v2677_v42  ;;  %v1549_v62 = vrot.slane %v1535_v57, %v2673_v39 }
0x138f   : > { %v1557_v63 = vrot.slane %v1549_v62, %v2677_v42 }
0x13fb   : > { %v1569_v7 = vpop.permute.xlu0 %1568 }
0x13fc   : > { %2138 = vmatmul.mubr.msk.f32.vlgmr.msra.gmra.mrb[8].mxu0 %vm421_vm4, %v1569_v7 }
0x14cf   : > { %v1638_v11 = vpop.f32.mrb[8].mxu0 }
0x14d0   : > { %v1643_v14 = vrot.slane %v1638_v11, 1  ;;  %v1646_v15 = vadd.f32 %v1638_v11, %v1566_v10  ;;  %v2139_v16 = vpop.f32.mrb[9].mxu0  ;;  %v727_v10 = vrot.slane %v719_v6, %v2673_v39 }
0x14d1   : > { %v1371_v16 = vrot.slane %v2647_v36, %v2673_v39 }
0x14d2   : > { %v1647_v17 = vadd.f32 %v1643_v14, %v1567_v9  ;;  %v1989_v12 = vmul.f32 -1.442695, %v1646_v15  ;;  %v738_v9 = vrot.slane %v727_v10, %v2677_v42 }
0x14d4   : > { %2353 = vpow2.f32 %v1989_v12  ;;  %v1990_v8 = vmul.f32 -1.442695, %v1647_v17 }
0x14d6   : > { %2355 = vpow2.f32 %v1990_v8 }
0x14d7   : > { %2357 = vtanh.f32 %v1647_v17  ;;  %v720_v17 = vcombine.high %v719_v6, %v719_v6 }
0x14de   : > { %v2354_v13 = vpop.eup %2353 }
0x14df   : > { %v1654_v19 = vadd.f32 1.0, %v2354_v13 }
0x14e0   : > { %v2356_v18 = vpop.eup %2355 }
0x14e1   : > { %v1655_v20 = vadd.f32 1.0, %v2356_v18  ;;  %v2358_v21 = vpop.eup %2357 }
0x14e2   : > { %v1669_v22 = vrot.slane %v2358_v21, 7 }
0x14e3   : > { %2359 = vrcp.f32 %v1655_v20  ;;  %v1372_v20 = vcombine.high %v1371_v16, %v1371_v16 }
0x14e4   : > { %2361 = vtanh.f32 %v1646_v15 }
0x14e5   : > { %2363 = vrcp.f32 %v1654_v19  ;;  %v734_v19 = vrot.slane %v720_v17, %v2673_v39 }
0x14ed   : > { %v2360_v23 = vpop.eup %2359 }
0x14ee   : > { %v2362_v25 = vpop.eup %2361  ;;  %v1664_v26 = vrot.slane %v2360_v23, 7 }
0x14ef   : > { %v2364_v27 = vpop.eup %2363  ;;  %v1670_v29 = vsel %vm518_vm5, %v1669_v22, %v2362_v25  ;;  %v742_v22 = vrot.slane %v734_v19, %v2677_v42 }
0x14f0   : > { %v1665_v28 = vsel %vm518_vm5, %v1664_v26, %v2364_v27  ;;  %v1386_v27 = vrot.slane %v1372_v20, %v2673_v39 }
0x14f1   : > { %v2668_v31 = vsel %vm418_vm6, %v1665_v28, %v1670_v29 }
0x14f2   : > { %1675 = vrot.lane.b32.xlu1 %v2668_v31, %s2411_s14  ;;  %v1673_v0 = vmul.f32 %v2668_v31, %v2658_v3  ;;  %v1045_v3 = vrot.slane %v2613_v30, %v2673_v39  ;;  %v1379_v30 = vrot.slane %v1371_v16, %v2673_v39  ;;  %v1394_v28 = vrot.slane %v1386_v27, %v2677_v42 }
0x14f4   : > { %v1053_v15 = vrot.slane %v1045_v3, %v2673_v39  ;;  %v1046_v13 = vcombine.high %v1045_v3, %v1045_v3  ;;  %v1390_v36 = vrot.slane %v1379_v30, %v2677_v42 }
0x14f6   : > { %v1064_v8 = vrot.slane %v1053_v15, %v2677_v42  ;;  %v1060_v23 = vrot.slane %v1046_v13, %v2673_v39 }
0x14f8   : > { %v1068_v26 = vrot.slane %v1060_v23, %v2677_v42 }
0x1564   : > { %v1676_v41 = vpop.permute.xlu1 %1675 }
0x1565   : > { %v1678_v44 = vmul.f32 %v1676_v41, %v2668_v31 }
0x1567   : > { %1680 = vrot.lane.b32.xlu0 %v1678_v44, %s2411_s14 }
0x156b   : > { %579 = vrot.lane.b32.xlu0 %v574_v46, %s2412_s15 }
0x156f   : > { %906 = vrot.lane.b32.xlu0 %v901_v48, %s2412_s15 }
0x1573   : > { %1232 = vrot.lane.b32.xlu0 %v1227_v50, %s2412_s15 }
0x1577   : > { %1558 = vrot.lane.b32.xlu0 %v1553_v51, %s2412_s15 }
0x157b   : > { %581 = vrot.lane.b32.xlu0 %v578_v55, %s2412_s15  ;;  %v1991_v55 = vld [vmem:[%s2813_s5] ss:$0 sm:$0xff] }
0x157f   : > { %908 = vrot.lane.b32.xlu0 %v905_v59, %s2412_s15 }
0x1583   : > { %1234 = vrot.lane.b32.xlu0 %v1231_v61, %s2412_s15 }
0x1587   : > { %1560 = vrot.lane.b32.xlu0 %v1557_v63, %s2412_s15 }
0x15d9   : > { %v1681_v2 = vpop.permute.xlu0 %1680 }
0x15da   : > { %v2712_v4 = vadd.f32 %v1681_v2, %v1673_v0 }
0x15dc   : > { %2365 = vtanh.f32 %v2712_v4 }
0x15dd   : > { %v580_v5 = vpop.permute.xlu0 %579 }
0x15de   : > { %586 = vst.msk [vmem:[#allocation3] sm:$0x1] %vm585_vm7, %v580_v5 }
0x15e1   : > { %v907_v7 = vpop.permute.xlu0 %906 }
0x15e2   : > { %912 = vst.msk [vmem:[#allocation3 + $0x2] sm:$0x1] %vm585_vm7, %v907_v7 }
0x15e5   : > { %v1233_v11 = vpop.permute.xlu0 %1232 }
0x15e6   : > { %v2366_v14 = vpop.eup %2365  ;;  %1238 = vst.msk [vmem:[#allocation3 + $0x4] sm:$0x1] %vm585_vm7, %v1233_v11 }
0x15e7   : > { %1686 = vrot.lane.b32.xlu1 %v2366_v14, %s2411_s14  ;;  %s1847_s14 = scalar_lea.vmem (%p2485_p6), %s2814_s6, %s1995_s11 }
0x15e9   : > { %v1559_v24 = vpop.permute.xlu0 %1558 }
0x15ea   : > { %1564 = vst.msk [vmem:[#allocation3 + $0x6] sm:$0x1] %vm585_vm7, %v1559_v24 }
0x15eb   : > { %743 = vrot.lane.b32.xlu1 %v738_v9, %s2412_s15 }
0x15ed   : > { %v582_v12 = vpop.permute.xlu0 %581 }
0x15ee   : > { %587 = vst.msk [vmem:[#allocation3 + $0x8] sm:$0x1] %vm585_vm7, %v582_v12 }
0x15ef   : > { %1069 = vrot.lane.b32.xlu1 %v1064_v8, %s2412_s15 }
0x15f1   : > { %v909_v18 = vpop.permute.xlu0 %908 }
0x15f2   : > { %913 = vst.msk [vmem:[#allocation3 + $0xa] sm:$0x1] %vm585_vm7, %v909_v18 }
0x15f3   : > { %1395 = vrot.lane.b32.xlu1 %v1390_v36, %s2412_s15 }
0x15f5   : > { %v1235_v21 = vpop.permute.xlu0 %1234 }
0x15f6   : > { %1239 = vst.msk [vmem:[#allocation3 + $0xc] sm:$0x1] %vm585_vm7, %v1235_v21 }
0x15f7   : > { %745 = vrot.lane.b32.xlu1 %v742_v22, %s2412_s15 }
0x15f9   : > { %v1561_v25 = vpop.permute.xlu0 %1560 }
0x15fa   : > { %1565 = vst.msk [vmem:[#allocation3 + $0xe] sm:$0x1] %vm585_vm7, %v1561_v25 }
0x15fb   : > { %1071 = vrot.lane.b32.xlu1 %v1068_v26, %s2412_s15 }
0x15ff   : > { %1397 = vrot.lane.b32.xlu1 %v1394_v28, %s2412_s15 }
0x1659   : > { %v1687_v29 = vpop.permute.xlu1 %1686 }
0x165a   : > { %v1689_v37 = vmul.f32 %v1687_v29, %v2668_v31  ;;  %v2203_v31 = vpack.c.bf16 %v1744_v43, %v1743_v35 }
0x165c   : > { %v1697_v40 = vrot.slane %v1689_v37, %v2673_v39  ;;  %1729 = vrot.lane.b32.xlu0 %v1689_v37, %s2412_s15  ;;  %2204 = vmatprep.subr.bf16.mxu1 %v2203_v31 }
0x165d   : > { %v744_v41 = vpop.permute.xlu1 %743  ;;  %2206 = vmatpush3.bf16.msra.mxu1 %v2203_v31 }
0x165e   : > { %v1698_v44 = vcombine.high %v1697_v40, %v1697_v40  ;;  %v1705_v45 = vrot.slane %v1697_v40, %v2673_v39  ;;  %749 = vst.msk [vmem:[#allocation3 + $0x1] sm:$0x1] %vm585_vm7, %v744_v41 }
0x1660   : > { %v1716_v33 = vrot.slane %v1705_v45, %v2677_v42  ;;  %v1712_v46 = vrot.slane %v1698_v44, %v2673_v39 }
0x1661   : > { %v1070_v53 = vpop.permute.xlu1 %1069 }
0x1662   : > { %1075 = vst.msk [vmem:[#allocation3 + $0x3] sm:$0x1] %vm585_vm7, %v1070_v53  ;;  %1721 = vrot.lane.b32.xlu1 %v1716_v33, %s2412_s15  ;;  %v1720_v47 = vrot.slane %v1712_v46, %v2677_v42 }
0x1665   : > { %v1396_v48 = vpop.permute.xlu1 %1395 }
0x1666   : > { %1401 = vst.msk [vmem:[#allocation3 + $0x5] sm:$0x1] %vm585_vm7, %v1396_v48  ;;  %1723 = vrot.lane.b32.xlu1 %v1720_v47, %s2412_s15 }
0x1669   : > { %v746_v58 = vpop.permute.xlu1 %745 }
0x166a   : > { %750 = vst.msk [vmem:[#allocation3 + $0x9] sm:$0x1] %vm585_vm7, %v746_v58  ;;  %1735 = vrot.lane.b32.xlu1 %v2712_v4, %s2414_s8 }
0x166d   : > { %v1072_v39 = vpop.permute.xlu1 %1071 }
0x166e   : > { %1076 = vst.msk [vmem:[#allocation3 + $0xb] sm:$0x1] %vm585_vm7, %v1072_v39 }
0x1671   : > { %v1398_v49 = vpop.permute.xlu1 %1397 }
0x1672   : > { %1402 = vst.msk [vmem:[#allocation3 + $0xd] sm:$0x1] %vm585_vm7, %v1398_v49 }
0x16ce   : > { %v1730_v50 = vpop.permute.xlu0 %1729 }
0x16cf   : > { %1733 = vst.msk [vmem:[#allocation4] sm:$0x3] %vm1732_vm8, %v1730_v50 }
0x16d4   : > { %v1722_v42 = vpop.permute.xlu1 %1721 }
0x16d5   : > { %1727 = vst.msk [vmem:[#allocation3 + $0x7] sm:$0x1] %vm585_vm7, %v1722_v42 }
0x16d8   : > { %v1724_v1 = vpop.permute.xlu1 %1723 }
0x16d9   : > { %1728 = vst.msk [vmem:[#allocation3 + $0xf] sm:$0x1] %vm585_vm7, %v1724_v1 }
0x16dc   : > { %v1736_v51 = vpop.permute.xlu1 %1735  ;;  %v1739_v52 = vld [vmem:[#allocation3] sm:$0xff] }
0x16dd   : > { %1738 = vst.msk [vmem:[#allocation5] sm:$0x3] %vm1732_vm8, %v1736_v51  ;;  %2148 = vmatprep.mubr.msk.f32.mxu1 %vm421_vm4, %v1739_v52 }
0x16e0   : > { %v1740_v54 = vld [vmem:[#allocation3 + $0x8] sm:$0xff] }
0x16e1   : > { %2149 = vmatmul.mubr.msk.f32.vlgmr.msra.gmra.mrb[8].mxu1 %vm421_vm4, %v1740_v54 }
0x17b2   : > { %1842 = sbr.rel (!%p2485_p6) target bundleno = 6081 (0x17c1), region = 90 }
0x17b4   : > { %v2150_v56 = vpop.f32.mrb[8].mxu1 }
0x17b5   : > { %v1830_v57 = vadd.f32 %v2150_v56, %v1991_v55  ;;  %v1824_v59 = vpop.f32.mrb[9].mxu1 }
0x17b6   : > { %v1825_v60 = vadd.f32 %v1991_v55, %v1824_v59 }
0x17b7   : > { %1835 = vst.msk [vmem:[%s2501_s18 + $0x8] sm:$0xff] %vm1833_vm9, %v1830_v57 }
0x17b8   : > { %1834 = vst.msk [vmem:[%s2501_s18] sm:$0xff] %vm1833_vm9, %v1825_v60 }
0x17be   : > { %v1879_v62 = vld [vmem:[%s2501_s18 + $0x8] sm:$0xff] }
0x17bf   : > { %v1877_v61 = vld [vmem:[%s2501_s18] sm:$0xff]  ;;  %1880 = vst [vmem:[%s1847_s14 + $0x10] sm:$0xff] %v1879_v62 }
0x17c0   : > { %1878 = vst [vmem:[%s1847_s14] sm:$0xff] %v1877_v61 }
0x17c1 PF: > { %s16_s25 = sadd.s32 1, %s2405_s25   ;;  %s2816_s21 = smov %s2393_s22 }
0x17c2   : > { %p13_p12 = scmp.ge.s32.totalorder %s16_s25, 4   ;;  %s2817_s22 = smov %s2490_s7 }
0x17c3   : > { %s2818_s23 = smov %s2401_s24  ;;  %s2819_s24 = smov %s2821_s26 }
0x17c4   :  { %15 = sbr.rel (!%p13_p12) target bundleno = 3 (0x3), region = 159 }

</bundles_post_ra>
